<compile_context>
chip_gen: v7x
topology: tpu7x:2x2x1
jax: 0.10.0
libtpu: 0.0.40
codegen_flags: <defaults>
</compile_context>

<pallas_src>
import functools

import jax
import jax.numpy as jnp
from jax.experimental import pallas as pl
from jax.experimental.pallas import tpu as pltpu

MAX_TN = 8192            # hard cap on samples per tile (bounds in-kernel intermediates)


def _round_up(x, m):
    return (x + m - 1) // m * m


def _cdiv(a, b):
    return -(-a // b)


def _num_tensorcores():
    """Best-effort TensorCore count of the default device (2 on megacore chips)."""
    try:
        kind = jax.devices()[0].device_kind.lower()
    except Exception:
        return 1
    return 2 if ("v7" in kind or "v4" in kind) else 1


def _vmem_capacity_bytes():
    try:
        cap = getattr(pltpu.get_tpu_info(), "vmem_capacity_bytes", None)
        if cap:
            return int(cap)
    except Exception:
        pass
    return 64 * 1024 * 1024          # conservative default (v7x per-core VMEM)


def _eval_kernel(nvalid_ref, wc_ref, ws_ref, feat_ref, lab_ref, out_ref, *, tn, nt):
    """One (split s, sample-tile n) step.

    nvalid_ref : (1,)        SMEM scalar prefetch, true sample count
    wc_ref     : (D, Kp)     classifier weights, classifier axis on lanes (resident)
    ws_ref     : (D, Kp)     selector weights (resident)
    feat_ref   : (tn, D)     current feature tile, streamed straight from (N, D)
    lab_ref    : (1, tn)     current label tile (lane-dense)
    out_ref    : (1, 4, Kp)  accumulators: [sum(sel), sum(y*sel),
                                            sum(pred*sel), sum(y*pred*sel)]
    """
    s = pl.program_id(0)
    n = pl.program_id(1)

    @pl.when(n == 0)
    def _init():
        out_ref[...] = jnp.zeros_like(out_ref)

    feats = feat_ref[...]                                          # (tn, D)
    hp = jax.lax.Precision.HIGHEST
    # Classify(w, x) = indicator(<w, x> >= 0); HIGHEST matches the f32 reference.
    cls_scores = jnp.dot(feats, wc_ref[...], precision=hp,
                         preferred_element_type=jnp.float32)       # (tn, Kp)
    sel_scores = jnp.dot(feats, ws_ref[...], precision=hp,
                         preferred_element_type=jnp.float32)       # (tn, Kp)

    sel_f = (sel_scores >= 0.0).astype(jnp.float32)                # selection in {0,1}
    predsel = jnp.where(cls_scores >= 0.0, sel_f, 0.0)             # pred * sel

    # Reduction LHS: row0 = ragged-tail validity mask, row1 = label * validity,
    # rows 2..7 zero padding (keeps the matmul M-dim sublane aligned).  tile_off is
    # the *unclamped* logical offset, so clamped overflow blocks mask to zero.
    tile_off = (s * nt + n) * tn
    lane = jax.lax.broadcasted_iota(jnp.int32, (1, tn), 1)
    valid = (tile_off + lane) < nvalid_ref[0]                      # (1, tn)
    valid_f = valid.astype(jnp.float32)
    y_valid = jnp.where(valid, lab_ref[...].astype(jnp.float32), 0.0)
    lhs = jnp.concatenate(
        [valid_f, y_valid, jnp.zeros((6, tn), jnp.float32)], axis=0)   # (8, tn)

    # Per-sample reductions on the (otherwise idle) MXU; exact: 0/1 inputs, f32 acc.
    r_sel = jnp.dot(lhs, sel_f, preferred_element_type=jnp.float32)    # (8, Kp)
    r_ps = jnp.dot(lhs, predsel, preferred_element_type=jnp.float32)   # (8, Kp)

    out_ref[0] += jnp.concatenate([r_sel[0:2], r_ps[0:2]], axis=0)     # (4, Kp)


def _conditional_error_sums(classifiers, selectors, features, labels):
    """Per-classifier (sum(errors*selections), sum(selections)), each shape (K,)."""
    K, D = classifiers.shape
    N = features.shape[0]
    if not jnp.issubdtype(features.dtype, jnp.floating):
        features = features.astype(jnp.float32)
    itemsize = jnp.dtype(features.dtype).itemsize
    Kp = _round_up(K, 128)                     # classifier axis lane-padded

    nsplit = _num_tensorcores()                # 1 on v5e/v6e, 2 on v7x/v4 megacore
    vmem_cap = _vmem_capacity_bytes()

    # ---- sample-tile sizing by bytes: double-buffered feature tile (lane-padded when
    # D < 128) + f32 score/indicator intermediates + label tile + reduction lhs. ----
    per_tn = (2 * _round_up(D, 128) * itemsize     # 2x feature buffers
              + 4 * Kp * 4                         # score/indicator intermediates
              + 2 * 8 * 4                          # 2x (1, tn) label buffers
              + 8 * 4)                             # reduction lhs
    w_bytes = 2 * 2 * _round_up(D, 8) * Kp * itemsize   # resident weights (2 ops, 2 bufs)
    # TODO(synk): for very large K*D add a classifier-axis grid dim instead of keeping
    # the full (D, Kp) weight blocks resident.
    budget = max(int(vmem_cap * 0.45) - w_bytes, per_tn * 128)
    tn_cap = max(128, min(MAX_TN, (budget // per_tn) // 128 * 128))
    tn = min(tn_cap, _round_up(_cdiv(N, nsplit), 128))

    nt_total = _cdiv(N, tn)                    # real sample tiles
    nt = _cdiv(nt_total, nsplit)               # tiles per split
    last_blk = nt_total - 1

    # Tiny weight staging: transpose + lane-pad so the classifier axis lands on lanes.
    wdt = features.dtype
    wc = jnp.zeros((D, Kp), wdt).at[:, :K].set(classifiers.astype(wdt).T)
    ws = jnp.zeros((D, Kp), wdt).at[:, :K].set(selectors.astype(wdt).T)

    labs = labels.astype(jnp.float32).reshape(1, N)   # free reshape, no copy / pad
    n_valid = jnp.array([N], jnp.int32)

    kernel = functools.partial(_eval_kernel, tn=tn, nt=nt)

    out = pl.pallas_call(
        kernel,
        out_shape=jax.ShapeDtypeStruct((nsplit, 4, Kp), jnp.float32),
        grid_spec=pltpu.PrefetchScalarGridSpec(
            num_scalar_prefetch=1,
            grid=(nsplit, nt),
            in_specs=[
                pl.BlockSpec((D, Kp), lambda s, n, nv: (0, 0)),        # classifiers
                pl.BlockSpec((D, Kp), lambda s, n, nv: (0, 0)),        # selectors
                # Features streamed directly from the caller's (N, D) array: no
                # transpose, no padding copy.  Overflow blocks of the last split are
                # clamped to the last real block and fully masked in-kernel.
                pl.BlockSpec((tn, D),
                             lambda s, n, nv: (jnp.minimum(s * nt + n, last_blk), 0)),
                pl.BlockSpec((1, tn),
                             lambda s, n, nv: (0, jnp.minimum(s * nt + n, last_blk))),
            ],
            out_specs=pl.BlockSpec((1, 4, Kp), lambda s, n, nv: (s, 0, 0)),
        ),
        compiler_params=pltpu.CompilerParams(
            dimension_semantics=("parallel", "arbitrary"),
            vmem_limit_bytes=int(vmem_cap * 0.75)),
    )(n_valid, wc, ws, features, labs)

    tot = jnp.sum(out, axis=0)                 # combine per-split partial sums: (4, Kp)
    sel_sum = tot[0, :K]
    # err*sel = pred*sel + y*sel - 2*y*pred*sel  (indicator algebra, all sums exact)
    err_sum = tot[2, :K] + tot[1, :K] - 2.0 * tot[3, :K]
    return err_sum, sel_sum


def _conditional_error_rates(classifiers, selectors, features, labels):
    errsum, selsum = _conditional_error_sums(classifiers, selectors, features, labels)
    cond_err = errsum / selsum
    return jnp.where(jnp.isnan(cond_err), 1.0, cond_err)    # nan -> 1


def evaluate(features, labels, classifiers, selectors):
    """Mirror of ConditionalLearnerForFiniteClass.evaluate."""
    cond_err = _conditional_error_rates(classifiers, selectors, features, labels)
    min_index = jnp.argmin(cond_err)          # first minimum, like torch.min
    return classifiers[min_index], selectors[min_index]


class ConditionalLearnerForFiniteClass:
    """JAX/Pallas port of the PyTorch module (forward semantics of `evaluate`)."""

    def __init__(self, prev_header, dim_sample, num_iter, sample_size_psgd,
                 lr_coeff=0.5, batch_size=32):
        self.header = ' '.join([prev_header, 'conditional learner', '-'])
        self.dim_sample = dim_sample
        self.num_iter = num_iter
        self.batch_size = batch_size
        self.sample_size_psgd = sample_size_psgd
        self.lr_beta = lr_coeff * jnp.sqrt(jnp.float32(1.0 / (num_iter * dim_sample)))
        # deterministic init_weight: zeros with 1 in coordinate 0
        self.init_weight = jnp.zeros((dim_sample,), jnp.float32).at[0].set(1.0)

    def evaluate(self, features, labels, classifiers, selectors):
        return evaluate(features, labels, classifiers, selectors)

    def forward(self, features, labels, classifier_clusters):
        """
        features           : (N, D) float32
        labels             : (N,)   float32 in {0,1}
        classifier_clusters: list of (K_i, D) dense classifier weight matrices
        """
        sizes = [int(c.shape[0]) for c in classifier_clusters]
        all_cls = jnp.concatenate(
            [c.astype(jnp.float32) for c in classifier_clusters], axis=0)
        # TODO(synk): SelectorPerceptron / PSGD training and random_split are external
        # modules not provided; selectors default deterministically to init_weight.
        all_sel = jnp.broadcast_to(self.init_weight, all_cls.shape)

        # Single fused pass over the data for every classifier of every cluster.
        cond_err = _conditional_error_rates(all_cls, all_sel, features, labels)

        # Per-cluster winner, then cross-cluster winner.  Re-evaluating the candidates
        # on the same eval data (as the reference does) reproduces exactly these
        # conditional errors, so the selection below is equivalent with no extra pass.
        best_errs, best_rows = [], []
        off = 0
        for k in sizes:
            seg = cond_err[off:off + k]
            idx = jnp.argmin(seg)
            best_errs.append(seg[idx])
            best_rows.append(off + idx)
            off += k
        winner = jnp.argmin(jnp.stack(best_errs))
        row = jnp.stack(best_rows)[winner]
        return all_cls[row], all_sel[row]


# ----------------------------- reference (pure JAX) -----------------------------

def _ref_evaluate(features, labels, classifiers, selectors):
    hp = jax.lax.Precision.HIGHEST
    preds = (jnp.matmul(classifiers, features.T, precision=hp) >= 0).astype(jnp.float32)
    sels = (jnp.matmul(selectors, features.T, precision=hp) >= 0).astype(jnp.float32)
    errs = (preds != labels[None, :]).astype(jnp.float32)
    ce = jnp.sum(errs * sels, axis=-1) / jnp.sum(sels, axis=-1)
    ce = jnp.where(jnp.isnan(ce), 1.0, ce)
    i = jnp.argmin(ce)
    return classifiers[i], selectors[i]


if __name__ == "__main__":
    key = jax.random.PRNGKey(0)
    D = 32            # dim_sample
    N = 300           # deliberately NOT a multiple of the tile (exercises tail mask)
    Ks = [8, 5, 11]   # ragged cluster sizes

    k_feat, k_lab, k_cls = jax.random.split(key, 3)
    features = jax.random.normal(k_feat, (N, D), jnp.float32)
    labels = (jax.random.uniform(k_lab, (N,)) > 0.5).astype(jnp.float32)
    clusters = [
        jax.random.normal(jax.random.fold_in(k_cls, i), (k, D), jnp.float32)
        for i, k in enumerate(Ks)
    ]

    learner = ConditionalLearnerForFiniteClass(
        prev_header="test", dim_sample=D, num_iter=100, sample_size_psgd=128)

    best_classifier, best_selector = learner.forward(features, labels, clusters)
    jax.block_until_ready((best_classifier, best_selector))
    assert best_classifier.shape == (D,) and best_selector.shape == (D,)

    # pure-JAX reference of the two-stage reference forward
    cand_c, cand_s = [], []
    for c in clusters:
        s = jnp.broadcast_to(learner.init_weight, c.shape)
        bc, bs = _ref_evaluate(features, labels, c, s)
        cand_c.append(bc)
        cand_s.append(bs)
    ref_c, ref_s = _ref_evaluate(features, labels,
                                 jnp.stack(cand_c), jnp.stack(cand_s))
    assert jnp.allclose(best_classifier, ref_c)
    assert jnp.allclose(best_selector, ref_s)

    print("KERNEL_OK")
</pallas_src>

<mosaic_0001>
module attributes {stable_mosaic.version = 11 : i64} {
  func.func @_eval_kernel(%arg0: i32, %arg1: i32, %arg2: memref<1xi32, #tpu.memory_space<smem>>, %arg3: memref<32x128xf32, #tpu.memory_space<vmem>>, %arg4: memref<32x128xf32, #tpu.memory_space<vmem>>, %arg5: memref<384x32xf32, #tpu.memory_space<vmem>>, %arg6: memref<1x384xf32, #tpu.memory_space<vmem>>, %arg7: memref<1x4x128xf32, #tpu.memory_space<vmem>>) attributes {dimension_semantics = [#tpu.dimension_semantics<parallel>, #tpu.dimension_semantics<arbitrary>], iteration_bounds = array<i64: 1, 1>, scalar_prefetch = 1 : i64, scratch_operands = 0 : i64, tpu.core_type = #tpu.core_type<tc>, window_params = [{pipeline_mode = #tpu.pipeline_mode<synchronous>, transform_indices = @transform_0, window_bounds = array<i64: 32, 128>}, {pipeline_mode = #tpu.pipeline_mode<synchronous>, transform_indices = @transform_1, window_bounds = array<i64: 32, 128>}, {transform_indices = @transform_2, window_bounds = array<i64: 384, 32>}, {transform_indices = @transform_3, window_bounds = array<i64: 1, 384>}, {transform_indices = @transform_4, window_bounds = array<i64: 1, 4, 128>}]} {
    %c0_i32 = arith.constant 0 : i32
    %0 = arith.cmpi eq, %arg1, %c0_i32 : i32
    %1 = arith.extui %0 : i1 to i32
    %c0_i32_0 = arith.constant 0 : i32
    %2 = arith.cmpi ne, %1, %c0_i32_0 : i32
    scf.if %2 {
      %cst_23 = arith.constant 0.000000e+00 : f32
      %43 = vector.broadcast %cst_23 : f32 to vector<1x4x128xf32>
      %c0_24 = arith.constant 0 : index
      %c0_25 = arith.constant 0 : index
      %c0_26 = arith.constant 0 : index
      %44 = vector.load %arg7[%c0_24, %c0_25, %c0_26] : memref<1x4x128xf32, #tpu.memory_space<vmem>>, vector<1x4x128xf32>
      tpu.vector_store %arg7[%c0_24, %c0_25, %c0_26], %43 {strides = array<i32>} : memref<1x4x128xf32, #tpu.memory_space<vmem>>, vector<1x4x128xf32>,
    } else {
    }
    %c0 = arith.constant 0 : index
    %c0_1 = arith.constant 0 : index
    %3 = vector.load %arg5[%c0, %c0_1] : memref<384x32xf32, #tpu.memory_space<vmem>>, vector<384x32xf32>
    %c0_2 = arith.constant 0 : index
    %c0_3 = arith.constant 0 : index
    %4 = vector.load %arg3[%c0_2, %c0_3] : memref<32x128xf32, #tpu.memory_space<vmem>>, vector<32x128xf32>
    %cst = arith.constant dense<0.000000e+00> : vector<384x128xf32>
    %5 = tpu.matmul %3, %4, %cst {dimension_numbers = #tpu.dot_dimension_numbers<[1], [0], [0], [1], [0, 0, 1, 1], [], []>, precision = #tpu.contract_precision<fp32>} : vector<384x32xf32>, vector<32x128xf32>, vector<384x128xf32> -> vector<384x128xf32>
    %c0_4 = arith.constant 0 : index
    %c0_5 = arith.constant 0 : index
    %6 = vector.load %arg4[%c0_4, %c0_5] : memref<32x128xf32, #tpu.memory_space<vmem>>, vector<32x128xf32>
    %cst_6 = arith.constant dense<0.000000e+00> : vector<384x128xf32>
    %7 = tpu.matmul %3, %6, %cst_6 {dimension_numbers = #tpu.dot_dimension_numbers<[1], [0], [0], [1], [0, 0, 1, 1], [], []>, precision = #tpu.contract_precision<fp32>} : vector<384x32xf32>, vector<32x128xf32>, vector<384x128xf32> -> vector<384x128xf32>
    %cst_7 = arith.constant 0.000000e+00 : f32
    %8 = vector.broadcast %cst_7 : f32 to vector<384x128xf32>
    %9 = arith.cmpf oge, %7, %8 : vector<384x128xf32>
    %10 = arith.extui %9 : vector<384x128xi1> to vector<384x128xi32>
    %11 = arith.sitofp %10 : vector<384x128xi32> to vector<384x128xf32>
    %cst_8 = arith.constant 0.000000e+00 : f32
    %12 = vector.broadcast %cst_8 : f32 to vector<384x128xf32>
    %13 = arith.cmpf oge, %5, %12 : vector<384x128xf32>
    %cst_9 = arith.constant 0.000000e+00 : f32
    %14 = vector.broadcast %cst_9 : f32 to vector<384x128xf32>
    %15 = arith.select %13, %11, %14 : vector<384x128xi1>, vector<384x128xf32>
    %c1_i32 = arith.constant 1 : i32
    %16 = arith.muli %arg0, %c1_i32 : i32
    %17 = arith.addi %16, %arg1 : i32
    %c384_i32 = arith.constant 384 : i32
    %18 = arith.muli %17, %c384_i32 : i32
    %19 = tpu.iota {dimensions = array<i32: 1>} : vector<1x384xi32>
    %20 = vector.broadcast %18 : i32 to vector<1x384xi32>
    %21 = arith.addi %20, %19 : vector<1x384xi32>
    %c0_10 = arith.constant 0 : index
    %22 = memref.load %arg2[%c0_10] : memref<1xi32, #tpu.memory_space<smem>>
    %23 = vector.broadcast %22 : i32 to vector<1x384xi32>
    %24 = arith.cmpi slt, %21, %23 : vector<1x384xi32>
    %25 = arith.extui %24 : vector<1x384xi1> to vector<1x384xi32>
    %26 = arith.sitofp %25 : vector<1x384xi32> to vector<1x384xf32>
    %c0_11 = arith.constant 0 : index
    %c0_12 = arith.constant 0 : index
    %27 = vector.load %arg6[%c0_11, %c0_12] : memref<1x384xf32, #tpu.memory_space<vmem>>, vector<1x384xf32>
    %cst_13 = arith.constant 0.000000e+00 : f32
    %28 = vector.broadcast %cst_13 : f32 to vector<1x384xf32>
    %29 = arith.select %24, %27, %28 : vector<1x384xi1>, vector<1x384xf32>
    %cst_14 = arith.constant 0.000000e+00 : f32
    %30 = vector.broadcast %cst_14 : f32 to vector<6x384xf32>
    %31 = tpu.concatenate %26, %29, %30 in 0 : vector<1x384xf32>, vector<1x384xf32>, vector<6x384xf32> -> vector<8x384xf32>
    %cst_15 = arith.constant dense<0.000000e+00> : vector<8x128xf32>
    %32 = tpu.matmul %31, %11, %cst_15 {dimension_numbers = #tpu.dot_dimension_numbers<[1], [0], [0], [1], [0, 0, 1, 1], [], []>} : vector<8x384xf32>, vector<384x128xf32>, vector<8x128xf32> -> vector<8x128xf32>
    %cst_16 = arith.constant dense<0.000000e+00> : vector<8x128xf32>
    %33 = tpu.matmul %31, %15, %cst_16 {dimension_numbers = #tpu.dot_dimension_numbers<[1], [0], [0], [1], [0, 0, 1, 1], [], []>} : vector<8x384xf32>, vector<384x128xf32>, vector<8x128xf32> -> vector<8x128xf32>
    %c0_17 = arith.constant 0 : index
    %c0_18 = arith.constant 0 : index
    %c0_19 = arith.constant 0 : index
    %34 = vector.load %arg7[%c0_17, %c0_18, %c0_19] : memref<1x4x128xf32, #tpu.memory_space<vmem>>, vector<1x4x128xf32>
    %35 = vector.shape_cast %34 : vector<1x4x128xf32> to vector<4x128xf32>
    %36 = vector.extract_strided_slice %32 {offsets = [0, 0], sizes = [2, 128], strides = [1, 1]} : vector<8x128xf32> to vector<2x128xf32>
    %37 = vector.extract_strided_slice %33 {offsets = [0, 0], sizes = [2, 128], strides = [1, 1]} : vector<8x128xf32> to vector<2x128xf32>
    %38 = tpu.concatenate %36, %37 in 0 : vector<2x128xf32>, vector<2x128xf32> -> vector<4x128xf32>
    %39 = arith.addf %35, %38 : vector<4x128xf32>
    %c0_20 = arith.constant 0 : index
    %c0_21 = arith.constant 0 : index
    %c0_22 = arith.constant 0 : index
    %40 = vector.load %arg7[%c0_20, %c0_21, %c0_22] : memref<1x4x128xf32, #tpu.memory_space<vmem>>, vector<1x4x128xf32>
    %41 = vector.shape_cast %40 : vector<1x4x128xf32> to vector<4x128xf32>
    %42 = vector.shape_cast %39 : vector<4x128xf32> to vector<1x4x128xf32>
    tpu.vector_store %arg7[%c0_20, %c0_21, %c0_22], %42 {strides = array<i32>} : memref<1x4x128xf32, #tpu.memory_space<vmem>>, vector<1x4x128xf32>,
    return
  }
  func.func @transform_0(%arg0: i32, %arg1: i32, %arg2: memref<1xi32, #tpu.memory_space<smem>>) -> (i32, i32) {
    %c0_i32 = arith.constant 0 : i32
    %c0_i32_0 = arith.constant 0 : i32
    %c0_i32_1 = arith.constant 0 : i32
    return %c0_i32, %c0_i32_0 : i32, i32
  }
  func.func @transform_1(%arg0: i32, %arg1: i32, %arg2: memref<1xi32, #tpu.memory_space<smem>>) -> (i32, i32) {
    %c0_i32 = arith.constant 0 : i32
    %c0_i32_0 = arith.constant 0 : i32
    %c0_i32_1 = arith.constant 0 : i32
    return %c0_i32, %c0_i32_0 : i32, i32
  }
  func.func @transform_2(%arg0: i32, %arg1: i32, %arg2: memref<1xi32, #tpu.memory_space<smem>>) -> (i32, i32) {
    %c1_i32 = arith.constant 1 : i32
    %0 = arith.muli %arg0, %c1_i32 : i32
    %1 = arith.addi %0, %arg1 : i32
    %c0_i32 = arith.constant 0 : i32
    %2 = arith.minsi %1, %c0_i32 : i32
    %c0_i32_0 = arith.constant 0 : i32
    %c0_i32_1 = arith.constant 0 : i32
    return %2, %c0_i32_0 : i32, i32
  }
  func.func @transform_3(%arg0: i32, %arg1: i32, %arg2: memref<1xi32, #tpu.memory_space<smem>>) -> (i32, i32) {
    %c1_i32 = arith.constant 1 : i32
    %0 = arith.muli %arg0, %c1_i32 : i32
    %1 = arith.addi %0, %arg1 : i32
    %c0_i32 = arith.constant 0 : i32
    %2 = arith.minsi %1, %c0_i32 : i32
    %c0_i32_0 = arith.constant 0 : i32
    %c0_i32_1 = arith.constant 0 : i32
    return %c0_i32_0, %2 : i32, i32
  }
  func.func @transform_4(%arg0: i32, %arg1: i32, %arg2: memref<1xi32, #tpu.memory_space<smem>>) -> (i32, i32, i32) {
    %c0_i32 = arith.constant 0 : i32
    %c0_i32_0 = arith.constant 0 : i32
    %c0_i32_1 = arith.constant 0 : i32
    return %arg0, %c0_i32, %c0_i32_0 : i32, i32, i32
  }
}

</mosaic_0001>

<bundles_post_ra>
// kernel: tpu_custom_call.1
= control target key start
LH: loop header
LB: loop body
LE: loop exit
PB: predicated region body
PF: predicated region fallthrough
CT: control target
= control target key end

     0   :  { %vm148_vm0 = vcmask 261120   ;;  %s10466_s0 = inlined_call_operand.<no memory space> [shape: s32[1], index: 0, kind: input, shape index: {}]   ;;  %s10467_s1 = inlined_call_operand.vmem [shape: f32[32,128], index: 1, kind: input, shape index: {}]   ;;  %s10468_s2 = inlined_call_operand.vmem [shape: f32[32,128], index: 2, kind: input, shape index: {}]   ;;  %s10469_s3 = inlined_call_operand.vmem [shape: f32[300,32], index: 3, kind: input, shape index: {}]   ;;  %s10470_s4 = inlined_call_operand.vmem [shape: f32[1,300], index: 4, kind: input, shape index: {}]   ;;  %s10471_s5 = inlined_call_operand.hbm [shape: f32[1,4,128], index: 5, kind: output, shape index: {}]  }
   0x1   :  { %v8607_v0 = vld [vmem:[%s10467_s1] sm:$0xff]  ;;  %v8612_v1 = vld [vmem:[%s10467_s1 + $0x8] sm:$0xff]  ;;  %v8630_v7 = vld [vmem:[%s10467_s1 + $0x10] sm:$0xff] }
   0x2   :  { %v8617_v2 = vld [vmem:[%s10468_s2] sm:$0xff]  ;;  %v10477_v3 = vand.u32 4294901760, %v8607_v0  ;;  %v10476_v4 = vand.u32 4294901760, %v8612_v1  ;;  %v8624_v5 = vld [vmem:[%s10468_s2 + $0x8] sm:$0xff]  ;;  %v8635_v8 = vld [vmem:[%s10467_s1 + $0x18] sm:$0xff]  ;;  %v10475_v10 = vand.u32 4294901760, %v8630_v7 }
   0x3   :  { %v10479_v6 = vand.u32 4294901760, %v8617_v2  ;;  %v10478_v9 = vand.u32 4294901760, %v8624_v5  ;;  %v10474_v11 = vand.u32 4294901760, %v8635_v8  ;;  %v8643_v12 = vld [vmem:[%s10468_s2 + $0x10] sm:$0xff]  ;;  %v8648_v13 = vld [vmem:[%s10468_s2 + $0x18] sm:$0xff]  ;;  %v96_v14 = vld [vmem:[%s10469_s3] sm:$0xff] }
   0x4   :  { %v8657_v15 = vpack.c.bf16 %v10476_v4, %v10477_v3  ;;  %v10473_v16 = vand.u32 4294901760, %v8643_v12  ;;  %v10472_v17 = vand.u32 4294901760, %v8648_v13  ;;  %v150_v18 = vsel %vm148_vm0, %v96_v14, 0  ;;  %v97_v19 = vld [vmem:[%s10469_s3 + $0x8] sm:$0xff]  ;;  %v98_v20 = vld [vmem:[%s10469_s3 + $0x10] sm:$0xff]  ;;  %v99_v21 = vld [vmem:[%s10469_s3 + $0x18] sm:$0xff] }
   0x5   :  { %v8675_v22 = vpack.c.bf16 %v10478_v9, %v10479_v6  ;;  %v8681_v23 = vpack.c.bf16 %v10474_v11, %v10475_v10  ;;  %v8683_v24 = vand.u32 4294901760, %v150_v18  ;;  %v153_v25 = vsel %vm148_vm0, %v97_v19, 0  ;;  %v100_v26 = vld [vmem:[%s10469_s3 + $0x20] sm:$0xff]  ;;  %v101_v27 = vld [vmem:[%s10469_s3 + $0x28] sm:$0xff]  ;;  %v102_v28 = vld [vmem:[%s10469_s3 + $0x30] sm:$0xff] }
   0x6   :  { %7829 = vmatprep.subr.bf16.mxu0 %v8657_v15  ;;  %v8700_v29 = vpack.c.bf16 %v10472_v17, %v10473_v16  ;;  %v8702_v30 = vand.u32 4294901760, %v153_v25  ;;  %v156_v31 = vsel %vm148_vm0, %v98_v20, 0  ;;  %v159_v32 = vsel %vm148_vm0, %v99_v21, 0  ;;  %v103_v37 = vld [vmem:[%s10469_s3 + $0x38] sm:$0xff]  ;;  %v104_v58 = vld [vmem:[%s10469_s3 + $0x40] sm:$0xff]  ;;  %v105_v20 = vld [vmem:[%s10469_s3 + $0x48] sm:$0xff] }
   0x7   :  { %10720 = vst [vmem:[#allocation7_spill] sm:$0xff] %v8681_v23  ;;  %7877 = vmatprep.subr.bf16.mxu1 %v8675_v22  ;;  %7831 = vmatpush3.bf16.msra.mxu0 %v8657_v15  ;;  %v8709_v33 = vsub.f32 %v150_v18, %v8683_v24  ;;  %v8711_v34 = vand.u32 4294901760, %v156_v31  ;;  %v8713_v35 = vand.u32 4294901760, %v159_v32  ;;  %v162_v36 = vsel %vm148_vm0, %v100_v26, 0  ;;  %v106_v21 = vld [vmem:[%s10469_s3 + $0x50] sm:$0xff] }
   0x8   :  { %10721 = vst [vmem:[#allocation8_spill] sm:$0xff] %v8700_v29  ;;  %7879 = vmatpush3.bf16.msra.mxu1 %v8675_v22  ;;  %7833 = vmatprep.subr.bf16.mxu0 %v8681_v23  ;;  %v8722_v38 = vsub.f32 %v153_v25, %v8702_v30  ;;  %v8724_v39 = vand.u32 4294901760, %v162_v36  ;;  %v165_v40 = vsel %vm148_vm0, %v101_v27, 0  ;;  %v168_v41 = vsel %vm148_vm0, %v102_v28, 0  ;;  %v107_v25 = vld [vmem:[%s10469_s3 + $0x58] sm:$0xff]  ;;  %v110_v17 = vld [vmem:[%s10469_s3 + $0x70] sm:$0xff] }
   0x9   :  { %10722 = vst [vmem:[#allocation9_spill] sm:$0xff] %v8709_v33  ;;  %7881 = vmatprep.subr.bf16.mxu1 %v8700_v29  ;;  %v8730_v42 = vand.u32 4294901760, %v8709_v33  ;;  %v8733_v43 = vsub.f32 %v156_v31, %v8711_v34  ;;  %v8736_v44 = vsub.f32 %v159_v32, %v8713_v35  ;;  %v8738_v45 = vand.u32 4294901760, %v165_v40 }
   0xa   :  { %10723 = vst [vmem:[#allocation10_spill] sm:$0xff] %v8722_v38  ;;  %v8741_v46 = vand.u32 4294901760, %v8722_v38  ;;  %v8744_v47 = vsub.f32 %v162_v36, %v8724_v39  ;;  %v8746_v48 = vand.u32 4294901760, %v168_v41  ;;  %v171_v49 = vsel %vm148_vm0, %v103_v37, 0 }
   0xb   :  { %10724 = vst [vmem:[#allocation11_spill] sm:$0xff] %v8730_v42  ;;  %10725 = vst [vmem:[#allocation12_spill] sm:$0xff] %v8733_v43  ;;  %7835 = vmatpush3.bf16.msra.mxu0 %v8681_v23  ;;  %v365_v50 = vsub.f32 %v8709_v33, %v8730_v42  ;;  %v8753_v51 = vand.u32 4294901760, %v8733_v43  ;;  %v8756_v52 = vand.u32 4294901760, %v8736_v44  ;;  %v8759_v53 = vsub.f32 %v165_v40, %v8738_v45  ;;  %v108_v40 = vld [vmem:[%s10469_s3 + $0x60] sm:$0xff] }
   0xc   :  { %10726 = vst [vmem:[#allocation13_spill] sm:$0xff] %v8736_v44  ;;  %10727 = vst [vmem:[#allocation14_spill] sm:$0xff] %v8741_v46  ;;  %7883 = vmatpush3.bf16.msra.mxu1 %v8700_v29  ;;  %v375_v54 = vsub.f32 %v8722_v38, %v8741_v46  ;;  %v8765_v55 = vand.u32 4294901760, %v8744_v47  ;;  %v8768_v56 = vsub.f32 %v168_v41, %v8746_v48  ;;  %v8770_v57 = vand.u32 4294901760, %v171_v49  ;;  %v109_v41 = vld [vmem:[%s10469_s3 + $0x68] sm:$0xff] }
   0xd   :  { %10728 = vst [vmem:[#allocation15_spill] sm:$0xff] %v8744_v47  ;;  %10729 = vst [vmem:[#allocation16_spill] sm:$0xff] %v8753_v51  ;;  %v366_v59 = vand.u32 4294901760, %v365_v50  ;;  %v385_v60 = vsub.f32 %v8733_v43, %v8753_v51  ;;  %v395_v61 = vsub.f32 %v8736_v44, %v8756_v52  ;;  %v8780_v62 = vand.u32 4294901760, %v8759_v53 }
   0xe   :  { %10730 = vst [vmem:[#allocation17_spill] sm:$0xff] %v8756_v52  ;;  %10731 = vst [vmem:[#allocation18_spill] sm:$0xff] %v8759_v53  ;;  %v376_v63 = vand.u32 4294901760, %v375_v54  ;;  %v405_v14 = vsub.f32 %v8744_v47, %v8765_v55  ;;  %v8785_v18 = vand.u32 4294901760, %v8768_v56  ;;  %v8788_v19 = vsub.f32 %v171_v49, %v8770_v57 }
   0xf   :  { %10732 = vst [vmem:[#allocation19_spill] sm:$0xff] %v8765_v55  ;;  %10733 = vst [vmem:[#allocation20_spill] sm:$0xff] %v8768_v56  ;;  %6806 = vmatprep.mubr.f32.mxu0 %v366_v59  ;;  %7286 = vmatprep.mubr.f32.mxu1 %v366_v59  ;;  %v386_v26 = vand.u32 4294901760, %v385_v60  ;;  %v415_v27 = vsub.f32 %v8759_v53, %v8780_v62  ;;  %v174_v28 = vsel %vm148_vm0, %v104_v58, 0  ;;  %v396_v31 = vand.u32 4294901760, %v395_v61 }
  0x10   :  { %10734 = vst [vmem:[#allocation21_spill] sm:$0xff] %v8780_v62  ;;  %10735 = vst [vmem:[#allocation22_spill] sm:$0xff] %v8785_v18  ;;  %6807 = vmatmul.mubr.f32.vlgmr.msra.gmra.mrb[0].mxu0 %v376_v63  ;;  %7287 = vmatmul.mubr.f32.vlgmr.msra.gmra.mrb[0].mxu1 %v376_v63  ;;  %v425_v32 = vsub.f32 %v8768_v56, %v8785_v18  ;;  %v8805_v36 = vand.u32 4294901760, %v8788_v19  ;;  %v8807_v37 = vand.u32 4294901760, %v174_v28  ;;  %v406_v49 = vand.u32 4294901760, %v405_v14 }
  0x11   :  { %10736 = vst [vmem:[#allocation23_spill] sm:$0xff] %v8788_v19  ;;  %6809 = vmatprep.mubr.f32.mxu0 %v386_v26  ;;  %7289 = vmatprep.mubr.f32.mxu1 %v386_v26  ;;  %v177_v50 = vsel %vm148_vm0, %v105_v20, 0  ;;  %v180_v54 = vsel %vm148_vm0, %v106_v21, 0  ;;  %v183_v58 = vsel %vm148_vm0, %v107_v25, 0  ;;  %v416_v59 = vand.u32 4294901760, %v415_v27 }
  0x12   :  { %10737 = vst [vmem:[#allocation24_spill] sm:$0xff] %v8805_v36  ;;  %v426_v60 = vand.u32 4294901760, %v425_v32  ;;  %v8819_v61 = vsub.f32 %v174_v28, %v8807_v37  ;;  %v8821_v63 = vand.u32 4294901760, %v177_v50  ;;  %v8826_v16 = vand.u32 4294901760, %v180_v54  ;;  %v111_v32 = vld [vmem:[%s10469_s3 + $0x78] sm:$0xff] }
  0x13   :  { %v8828_v14 = vand.u32 4294901760, %v183_v58  ;;  %v186_v20 = vsel %vm148_vm0, %v108_v40, 0  ;;  %v189_v21 = vsel %vm148_vm0, %v109_v41, 0  ;;  %v435_v25 = vsub.f32 %v8788_v19, %v8805_v36 }
  0x14   :  { %10738 = vst [vmem:[#allocation25_spill] sm:$0xff] %v8819_v61  ;;  %6810 = vmatmul.mubr.f32.gmra.mrb[2].mxu0 %v396_v31  ;;  %7290 = vmatmul.mubr.f32.gmra.mrb[2].mxu1 %v396_v31  ;;  %v8835_v26 = vand.u32 4294901760, %v8819_v61  ;;  %v8838_v27 = vsub.f32 %v177_v50, %v8821_v63  ;;  %v8840_v28 = vand.u32 4294901760, %v186_v20 }
  0x16   :  { %10739 = vst [vmem:[#allocation26_spill] sm:$0xff] %v8835_v26  ;;  %10740 = vst [vmem:[#allocation27_spill] sm:$0xff] %v8838_v27 }
  0x17   :  { %11 = vsyncpa [#allocation5], 0  ;;  %6812 = vmatprep.mubr.f32.mxu0 %v406_v49  ;;  %7292 = vmatprep.mubr.f32.mxu1 %v406_v49  ;;  %v8846_v31 = vsub.f32 %v180_v54, %v8826_v16  ;;  %v8849_v40 = vsub.f32 %v183_v58, %v8828_v14  ;;  %v8851_v41 = vand.u32 4294901760, %v189_v21  ;;  %v192_v50 = vsel %vm148_vm0, %v110_v17, 0  ;;  %v112_v9 = vld [vmem:[%s10469_s3 + $0x80] sm:$0xff]  ;;  %v123_v53 = vld [vmem:[%s10469_s3 + $0xd8] sm:$0xff] }
  0x18   :  { %v445_v11 = vsub.f32 %v8819_v61, %v8835_v26  ;;  %v8857_v10 = vand.u32 4294901760, %v8838_v27  ;;  %v8860_v4 = vsub.f32 %v186_v20, %v8840_v28  ;;  %v8862_v49 = vand.u32 4294901760, %v192_v50  ;;  %6813 = vmatmul.mubr.f32.gmra.mrb[4].mxu0 %v416_v59  ;;  %7293 = vmatmul.mubr.f32.gmra.mrb[4].mxu1 %v416_v59  ;;  %v113_v59 = vld [vmem:[%s10469_s3 + $0x88] sm:$0xff]  ;;  %v116_v52 = vld [vmem:[%s10469_s3 + $0xa0] sm:$0xff] }
  0x19   :  { %10741 = vst [vmem:[#allocation28_spill] sm:$0xff] %v8846_v31  ;;  %10742 = vst [vmem:[#allocation29_spill] sm:$0xff] %v8849_v40  ;;  %v8865_v54 = vand.u32 4294901760, %v8846_v31  ;;  %v8868_v58 = vand.u32 4294901760, %v8849_v40  ;;  %v8871_v3 = vsub.f32 %v189_v21, %v8851_v41  ;;  %v195_v17 = vsel %vm148_vm0, %v111_v32, 0  ;;  %6815 = vmatprep.mubr.f32.mxu0 %v426_v60  ;;  %7295 = vmatprep.mubr.f32.mxu1 %v426_v60 }
  0x1a   :  { %10743 = vst [vmem:[#allocation30_spill] sm:$0xff] %v8857_v10  ;;  %10744 = vst [vmem:[#allocation31_spill] sm:$0xff] %v8860_v4  ;;  %v436_v20 = vand.u32 4294901760, %v435_v25  ;;  %v455_v6 = vsub.f32 %v8838_v27, %v8857_v10  ;;  %v8880_v26 = vand.u32 4294901760, %v8860_v4  ;;  %v446_v36 = vand.u32 4294901760, %v445_v11  ;;  %v114_v10 = vld [vmem:[%s10469_s3 + $0x90] sm:$0xff] }
  0x1b   :  { %10745 = vst [vmem:[#allocation32_spill] sm:$0xff] %v8865_v54  ;;  %10746 = vst [vmem:[#allocation33_spill] sm:$0xff] %v8868_v58  ;;  %v465_v21 = vsub.f32 %v8846_v31, %v8865_v54  ;;  %v8885_v32 = vsub.f32 %v192_v50, %v8862_v49  ;;  %v8887_v18 = vand.u32 4294901760, %v195_v17  ;;  %v198_v25 = vsel %vm148_vm0, %v112_v9, 0  ;;  %v115_v54 = vld [vmem:[%s10469_s3 + $0x98] sm:$0xff] }
  0x1c   :  { %10747 = vst [vmem:[#allocation34_spill] sm:$0xff] %v8871_v3  ;;  %10748 = vst [vmem:[#allocation35_spill] sm:$0xff] %v8880_v26  ;;  %v475_v11 = vsub.f32 %v8849_v40, %v8868_v58  ;;  %v8899_v60 = vand.u32 4294901760, %v8871_v3  ;;  %6816 = vmatmul.mubr.f32.gmra.mrb[6].mxu0 %v436_v20  ;;  %7296 = vmatmul.mubr.f32.gmra.mrb[6].mxu1 %v436_v20  ;;  %v456_v9 = vand.u32 4294901760, %v455_v6  ;;  %v8909_v55 = vand.u32 4294901760, %v198_v25  ;;  %v117_v20 = vld [vmem:[%s10469_s3 + $0xa8] sm:$0xff] }
  0x1d   :  { %10749 = vst [vmem:[#allocation36_spill] sm:$0xff] %v8885_v32  ;;  %v8902_v50 = vsub.f32 %v195_v17, %v8887_v18  ;;  %v485_v62 = vsub.f32 %v8860_v4, %v8880_v26  ;;  %v201_v58 = vsel %vm148_vm0, %v113_v59, 0  ;;  %6818 = vmatprep.mubr.f32.mxu0 %v446_v36  ;;  %7298 = vmatprep.mubr.f32.mxu1 %v446_v36  ;;  %v466_v17 = vand.u32 4294901760, %v465_v21  ;;  %v118_v40 = vld [vmem:[%s10469_s3 + $0xb0] sm:$0xff] }
  0x1e   :  { %10750 = vst [vmem:[#allocation37_spill] sm:$0xff] %v8899_v60  ;;  %v8916_v51 = vand.u32 4294901760, %v8885_v32  ;;  %v8918_v46 = vand.u32 4294901760, %v201_v58  ;;  %v204_v6 = vsel %vm148_vm0, %v114_v10, 0  ;;  %v8928_v26 = vsub.f32 %v198_v25, %v8909_v55 }
  0x1f   :  { %10751 = vst [vmem:[#allocation38_spill] sm:$0xff] %v8902_v50  ;;  %v8925_v59 = vand.u32 4294901760, %v8902_v50  ;;  %v8930_v42 = vand.u32 4294901760, %v204_v6  ;;  %v207_v36 = vsel %vm148_vm0, %v115_v54, 0  ;;  %v476_v21 = vand.u32 4294901760, %v475_v11 }
  0x20   :  { %10752 = vst [vmem:[#allocation39_spill] sm:$0xff] %v8916_v51  ;;  %10754 = vst [vmem:[#allocation41_spill] sm:$0xff] %v8928_v26  ;;  %v8934_v4 = vsub.f32 %v201_v58, %v8918_v46  ;;  %v210_v10 = vsel %vm148_vm0, %v116_v52, 0  ;;  %6819 = vmatmul.mubr.f32.gmra.mrb[8].mxu0 %v456_v9  ;;  %7299 = vmatmul.mubr.f32.gmra.mrb[8].mxu1 %v456_v9  ;;  %v486_v31 = vand.u32 4294901760, %v485_v62  ;;  %v8942_v27 = vand.u32 4294901760, %v207_v36  ;;  %v119_v62 = vld [vmem:[%s10469_s3 + $0xb8] sm:$0xff] }
  0x21   :  { %10753 = vst [vmem:[#allocation40_spill] sm:$0xff] %v8925_v59  ;;  %v495_v25 = vsub.f32 %v8871_v3, %v8899_v60  ;;  %v213_v54 = vsel %vm148_vm0, %v117_v20, 0  ;;  %6821 = vmatprep.mubr.f32.mxu0 %v466_v17  ;;  %7301 = vmatprep.mubr.f32.mxu1 %v466_v17  ;;  %v505_v58 = vsub.f32 %v8885_v32, %v8916_v51  ;;  %v8948_v52 = vand.u32 4294901760, %v8928_v26 }
  0x22   :  { %10755 = vst [vmem:[#allocation42_spill] sm:$0xff] %v8934_v4  ;;  %v8951_v11 = vsub.f32 %v204_v6, %v8930_v42  ;;  %v8953_v9 = vand.u32 4294901760, %v210_v10  ;;  %v515_v20 = vsub.f32 %v8902_v50, %v8925_v59  ;;  %v216_v17 = vsel %vm148_vm0, %v118_v40, 0  ;;  %v120_v6 = vld [vmem:[%s10469_s3 + $0xc0] sm:$0xff] }
  0x23   :  { %10756 = vst [vmem:[#allocation43_spill] sm:$0xff] %v8948_v52  ;;  %v8962_v60 = vand.u32 4294901760, %v8934_v4  ;;  %v8964_v51 = vand.u32 4294901760, %v213_v54  ;;  %v8966_v32 = vand.u32 4294901760, %v216_v17  ;;  %v496_v3 = vand.u32 4294901760, %v495_v25 }
  0x24   :  { %10757 = vst [vmem:[#allocation44_spill] sm:$0xff] %v8951_v11  ;;  %6822 = vmatmul.mubr.f32.gmra.mrb[10].mxu0 %v476_v21  ;;  %7302 = vmatmul.mubr.f32.gmra.mrb[10].mxu1 %v476_v21  ;;  %v8972_v61 = vsub.f32 %v207_v36, %v8942_v27  ;;  %v219_v59 = vsel %vm148_vm0, %v119_v62, 0  ;;  %v506_v40 = vand.u32 4294901760, %v505_v58  ;;  %v525_v50 = vsub.f32 %v8928_v26, %v8948_v52  ;;  %v121_v21 = vld [vmem:[%s10469_s3 + $0xc8] sm:$0xff]  ;;  %v122_v36 = vld [vmem:[%s10469_s3 + $0xd0] sm:$0xff] }
  0x25   :  { %10758 = vst [vmem:[#allocation45_spill] sm:$0xff] %v8962_v60  ;;  %10759 = vst [vmem:[#allocation46_spill] sm:$0xff] %v8966_v32  ;;  %6824 = vmatprep.mubr.f32.mxu0 %v486_v31  ;;  %7304 = vmatprep.mubr.f32.mxu1 %v486_v31  ;;  %v8978_v19 = vand.u32 4294901760, %v8951_v11  ;;  %v8981_v56 = vsub.f32 %v210_v10, %v8953_v9  ;;  %v516_v25 = vand.u32 4294901760, %v515_v20  ;;  %v8989_v31 = vand.u32 4294901760, %v219_v59 }
  0x26   :  { %10760 = vst [vmem:[#allocation47_spill] sm:$0xff] %v8972_v61  ;;  %v222_v58 = vsel %vm148_vm0, %v120_v6, 0  ;;  %v535_v62 = vsub.f32 %v8934_v4, %v8962_v60  ;;  %v8995_v52 = vsub.f32 %v213_v54, %v8964_v51  ;;  %v8998_v10 = vsub.f32 %v216_v17, %v8966_v32 }
  0x27   :  { %10761 = vst [vmem:[#allocation48_spill] sm:$0xff] %v8978_v19  ;;  %10762 = vst [vmem:[#allocation49_spill] sm:$0xff] %v8981_v56  ;;  %v9000_v26 = vand.u32 4294901760, %v222_v58  ;;  %v9006_v20 = vand.u32 4294901760, %v8972_v61  ;;  %v9009_v6 = vsub.f32 %v219_v59, %v8989_v31  ;;  %v225_v54 = vsel %vm148_vm0, %v121_v21, 0  ;;  %v124_v59 = vld [vmem:[%s10469_s3 + $0xe0] sm:$0xff] }
  0x28   :  { %10763 = vst [vmem:[#allocation50_spill] sm:$0xff] %v8989_v31  ;;  %10764 = vst [vmem:[#allocation51_spill] sm:$0xff] %v8995_v52  ;;  %6825 = vmatmul.mubr.f32.gmra.mrb[12].mxu0 %v496_v3  ;;  %7305 = vmatmul.mubr.f32.gmra.mrb[12].mxu1 %v496_v3  ;;  %v228_v60 = vsel %vm148_vm0, %v122_v36, 0  ;;  %v526_v17 = vand.u32 4294901760, %v525_v50  ;;  %v545_v4 = vsub.f32 %v8951_v11, %v8978_v19  ;;  %v9016_v47 = vand.u32 4294901760, %v8981_v56  ;;  %v125_v11 = vld [vmem:[%s10469_s3 + $0xe8] sm:$0xff] }
  0x29   :  { %10765 = vst [vmem:[#allocation52_spill] sm:$0xff] %v8998_v10  ;;  %10766 = vst [vmem:[#allocation53_spill] sm:$0xff] %v9000_v26  ;;  %6827 = vmatprep.mubr.f32.mxu0 %v506_v40  ;;  %7307 = vmatprep.mubr.f32.mxu1 %v506_v40  ;;  %v9018_v3 = vand.u32 4294901760, %v225_v54  ;;  %v9024_v44 = vsub.f32 %v222_v58, %v9000_v26  ;;  %v9026_v21 = vand.u32 4294901760, %v228_v60  ;;  %v231_v40 = vsel %vm148_vm0, %v123_v53, 0 }
  0x2a   :  { %10767 = vst [vmem:[#allocation54_spill] sm:$0xff] %v9006_v20  ;;  %10768 = vst [vmem:[#allocation55_spill] sm:$0xff] %v9009_v6  ;;  %v9030_v50 = vand.u32 4294901760, %v8995_v52  ;;  %v9033_v36 = vand.u32 4294901760, %v8998_v10  ;;  %v9036_v19 = vand.u32 4294901760, %v9009_v6  ;;  %v536_v58 = vand.u32 4294901760, %v535_v62 }
  0x2b   :  { %10769 = vst [vmem:[#allocation56_spill] sm:$0xff] %v9016_v47  ;;  %10770 = vst [vmem:[#allocation57_spill] sm:$0xff] %v9018_v3  ;;  %v555_v29 = vsub.f32 %v8972_v61, %v9006_v20  ;;  %v234_v53 = vsel %vm148_vm0, %v124_v59, 0  ;;  %v546_v23 = vand.u32 4294901760, %v545_v4  ;;  %v565_v43 = vsub.f32 %v8981_v56, %v9016_v47  ;;  %v126_v47 = vld [vmem:[%s10469_s3 + $0xf0] sm:$0xff] }
  0x2c   :  { %10771 = vst [vmem:[#allocation58_spill] sm:$0xff] %v9024_v44  ;;  %10772 = vst [vmem:[#allocation59_spill] sm:$0xff] %v9026_v21  ;;  %6828 = vmatmul.mubr.f32.gmra.mrb[14].mxu0 %v516_v25  ;;  %7308 = vmatmul.mubr.f32.gmra.mrb[14].mxu1 %v516_v25  ;;  %v9047_v38 = vsub.f32 %v225_v54, %v9018_v3  ;;  %v9049_v33 = vand.u32 4294901760, %v231_v40  ;;  %v9052_v26 = vand.u32 4294901760, %v9024_v44  ;;  %v237_v62 = vsel %vm148_vm0, %v125_v11, 0 }
  0x2d   :  { %10773 = vst [vmem:[#allocation60_spill] sm:$0xff] %v9030_v50  ;;  %10774 = vst [vmem:[#allocation61_spill] sm:$0xff] %v9033_v36  ;;  %6830 = vmatprep.mubr.f32.mxu0 %v526_v17  ;;  %7310 = vmatprep.mubr.f32.mxu1 %v526_v17  ;;  %v9055_v25 = vsub.f32 %v228_v60, %v9026_v21  ;;  %v575_v17 = vsub.f32 %v8995_v52, %v9030_v50  ;;  %v9064_v59 = vand.u32 4294901760, %v234_v53  ;;  %vm5599_vm3 = vcmask 1040384  }
  0x2e   :  { %10775 = vst [vmem:[#allocation62_spill] sm:$0xff] %v9036_v19  ;;  %10776 = vst [vmem:[#allocation63_spill] sm:$0xff] %v9047_v38  ;;  %v585_v4 = vsub.f32 %v8998_v10, %v9033_v36  ;;  %v595_v54 = vsub.f32 %v9009_v6, %v9036_v19  ;;  %v556_v60 = vand.u32 4294901760, %v555_v29  ;;  %v566_v11 = vand.u32 4294901760, %v565_v43  ;;  %v127_v19 = vld [vmem:[%s10469_s3 + $0xf8] sm:$0xff] }
  0x2f   :  { %10777 = vst [vmem:[#allocation64_spill] sm:$0xff] %v9049_v33  ;;  %10778 = vst [vmem:[#allocation65_spill] sm:$0xff] %v9052_v26  ;;  %v9070_v50 = vand.u32 4294901760, %v9047_v38  ;;  %v9073_v36 = vsub.f32 %v231_v40, %v9049_v33  ;;  %v9075_v20 = vand.u32 4294901760, %v237_v62  ;;  %v9086_v29 = vand.u32 4294901760, %v9055_v25 }
  0x30   :  { %10779 = vst [vmem:[#allocation66_spill] sm:$0xff] %v9055_v25  ;;  %10780 = vst [vmem:[#allocation67_spill] sm:$0xff] %v9064_v59  ;;  %6831 = vmatmul.mubr.f32.gmra.mrb[16].mxu0 %v536_v58  ;;  %7311 = vmatmul.mubr.f32.gmra.mrb[16].mxu1 %v536_v58  ;;  %v128_v58 = vld [vmem:[%s10469_s3 + $0x100] sm:$0xff]  ;;  %v240_v43 = vsel %vm148_vm0, %v126_v47, 0  ;;  %v576_v40 = vand.u32 4294901760, %v575_v17  ;;  %v586_v6 = vand.u32 4294901760, %v585_v4  ;;  %v9090_v52 = vsub.f32 %v234_v53, %v9064_v59 }
  0x31   :  { %6833 = vmatprep.mubr.f32.mxu0 %v546_v23  ;;  %7313 = vmatprep.mubr.f32.mxu1 %v546_v23  ;;  %10781 = vst [vmem:[#allocation68_spill] sm:$0xff] %v9070_v50  ;;  %10782 = vst [vmem:[#allocation69_spill] sm:$0xff] %v9073_v36  ;;  %v605_v23 = vsub.f32 %v9024_v44, %v9052_v26  ;;  %v596_v10 = vand.u32 4294901760, %v595_v54  ;;  %v243_v56 = vsel %vm148_vm0, %v127_v19, 0  ;;  %v246_v61 = vsel %vm148_vm0, %v128_v58, 0  ;;  %v129_v53 = vld [vmem:[%s10469_s3 + $0x108] sm:$0xff] }
  0x32   :  { %10783 = vst [vmem:[#allocation70_spill] sm:$0xff] %v9075_v20  ;;  %10784 = vst [vmem:[#allocation71_spill] sm:$0xff] %v9086_v29  ;;  %v10786_v33 = vand.u32 4294901760, %v8617_v2  ;;  %v10787_v44 = vand.u32 4294901760, %v8624_v5  ;;  %v615_v19 = vsub.f32 %v9047_v38, %v9070_v50  ;;  %v9110_v17 = vand.u32 4294901760, %v9073_v36 }
  0x33   :  { %10785 = vst [vmem:[#allocation72_spill] sm:$0xff] %v9090_v52  ;;  %v606_v4 = vand.u32 4294901760, %v605_v23  ;;  %v625_v54 = vsub.f32 %v9055_v25, %v9086_v29  ;;  %v9130_v58 = vand.u32 4294901760, %v243_v56  ;;  %v9132_v50 = vand.u32 4294901760, %v246_v61  ;;  %v132_v23 = vld [vmem:[%s10469_s3 + $0x120] sm:$0xff] }
  0x34   :  { %6834 = vmatmul.mubr.f32.gmra.mrb[18].mxu0 %v556_v60  ;;  %7314 = vmatmul.mubr.f32.gmra.mrb[18].mxu1 %v556_v60  ;;  %v9097_v26 = vsub.f32 %v8617_v2, %v10786_v33  ;;  %v9102_v47 = vsub.f32 %v8624_v5, %v10787_v44  ;;  %10788 = vst [vmem:[#allocation73_spill] sm:$0xff] %v9110_v17  ;;  %v9115_v33 = vand.u32 4294901760, %v240_v43  ;;  %v130_v5 = vld [vmem:[%s10469_s3 + $0x110] sm:$0xff]  ;;  %v131_v44 = vld [vmem:[%s10469_s3 + $0x118] sm:$0xff]  ;;  %v249_v38 = vsel %vm148_vm0, %v129_v53, 0 }
  0x35   :  { %6836 = vmatprep.mubr.f32.mxu0 %v566_v11  ;;  %7316 = vmatprep.mubr.f32.mxu1 %v566_v11  ;;  %v9113_v2 = vsub.f32 %v237_v62, %v9075_v20  ;;  %v9128_v62 = vand.u32 4294901760, %v9090_v52  ;;  %10792 = vst [vmem:[#allocation77_spill] sm:$0xff] %v9130_v58  ;;  %10793 = vst [vmem:[#allocation78_spill] sm:$0xff] %v9132_v50  ;;  %v252_v20 = vsel %vm148_vm0, %v130_v5, 0  ;;  %v255_v59 = vsel %vm148_vm0, %v131_v44, 0  ;;  %v134_v5 = vld [vmem:[%s10469_s3 + $0x130] sm:$0xff] }
  0x36   :  { %10790 = vst [vmem:[#allocation75_spill] sm:$0xff] %v9115_v33  ;;  %v10605_v60 = vand.u32 4294901760, %v9097_v26  ;;  %v10604_v11 = vand.u32 4294901760, %v9102_v47  ;;  %v616_v53 = vand.u32 4294901760, %v615_v19  ;;  %v635_v21 = vsub.f32 %v9073_v36, %v9110_v17 }
  0x37   :  { %10789 = vst [vmem:[#allocation74_spill] sm:$0xff] %v9113_v2  ;;  %10791 = vst [vmem:[#allocation76_spill] sm:$0xff] %v9128_v62  ;;  %v9152_v3 = vsub.f32 %v240_v43, %v9115_v33  ;;  %v9160_v19 = vand.u32 4294901760, %v249_v38  ;;  %v9164_v17 = vsub.f32 %v243_v56, %v9130_v58  ;;  %v9167_v43 = vsub.f32 %v246_v61, %v9132_v50  ;;  %v135_v56 = vld [vmem:[%s10469_s3 + $0x138] sm:$0xff]  ;;  %v136_v61 = vld [vmem:[%s10469_s3 + $0x140] sm:$0xff] }
  0x38   :  { %6837 = vmatmul.mubr.f32.gmra.mrb[20].mxu0 %v576_v40  ;;  %7317 = vmatmul.mubr.f32.gmra.mrb[20].mxu1 %v576_v40  ;;  %v3356_v29 = vsub.f32 %v9097_v26, %v10605_v60  ;;  %v3363_v25 = vsub.f32 %v9102_v47, %v10604_v11  ;;  %v9149_v40 = vand.u32 4294901760, %v9113_v2  ;;  %v133_v11 = vld [vmem:[%s10469_s3 + $0x128] sm:$0xff]  ;;  %v258_v60 = vsel %vm148_vm0, %v132_v23, 0 }
  0x39   :  { %6839 = vmatprep.mubr.f32.mxu0 %v586_v6  ;;  %7319 = vmatprep.mubr.f32.mxu1 %v586_v6  ;;  %10795 = vst [vmem:[#allocation80_spill] sm:$0xff] %v9152_v3  ;;  %10796 = vst [vmem:[#allocation81_spill] sm:$0xff] %v9160_v19  ;;  %v9169_v36 = vand.u32 4294901760, %v252_v20  ;;  %v9171_v33 = vand.u32 4294901760, %v255_v59  ;;  %v9173_v32 = vand.u32 4294901760, %v258_v60  ;;  %v626_v23 = vand.u32 4294901760, %v625_v54 }
  0x3a   :  { %10794 = vst [vmem:[#allocation79_spill] sm:$0xff] %v9149_v40  ;;  %v3357_v44 = vand.u32 4294901760, %v3356_v29  ;;  %v3364_v6 = vand.u32 4294901760, %v3363_v25  ;;  %10797 = vst [vmem:[#allocation82_spill] sm:$0xff] %v9164_v17  ;;  %v261_v25 = vsel %vm148_vm0, %v133_v11, 0  ;;  %v264_v29 = vsel %vm148_vm0, %v134_v5, 0 }
  0x3b   :  { %10798 = vst [vmem:[#allocation83_spill] sm:$0xff] %v9167_v43  ;;  %10799 = vst [vmem:[#allocation84_spill] sm:$0xff] %v9169_v36  ;;  %v9188_v11 = vand.u32 4294901760, %v261_v25  ;;  %v636_v5 = vand.u32 4294901760, %v635_v21  ;;  %v9193_v50 = vand.u32 4294901760, %v264_v29  ;;  %v9196_v58 = vsub.f32 %v252_v20, %v9169_v36 }
  0x3c   :  { %10800 = vst [vmem:[#allocation85_spill] sm:$0xff] %v9171_v33  ;;  %6840 = vmatmul.mubr.f32.gmra.mrb[22].mxu0 %v596_v10  ;;  %7320 = vmatmul.mubr.f32.gmra.mrb[22].mxu1 %v596_v10  ;;  %v7884_v31 = vpack.c.bf16 %v3364_v6, %v3357_v44  ;;  %10801 = vst [vmem:[#allocation86_spill] sm:$0xff] %v9173_v32  ;;  %v645_v10 = vsub.f32 %v9090_v52, %v9128_v62  ;;  %v9186_v44 = vand.u32 4294901760, %v9152_v3  ;;  %vm10719_vm4 = vcmask 1041408  }
  0x3d   :  { %6842 = vmatprep.mubr.f32.mxu0 %v606_v4  ;;  %7322 = vmatprep.mubr.f32.mxu1 %v606_v4  ;;  %10803 = vst [vmem:[#allocation88_spill] sm:$0xff] %v9188_v11  ;;  %v9191_v6 = vsub.f32 %v249_v38, %v9160_v19  ;;  %10805 = vst [vmem:[#allocation90_spill] sm:$0xff] %v9193_v50  ;;  %v9199_v4 = vsub.f32 %v255_v59, %v9171_v33  ;;  %v267_v54 = vsel %vm148_vm0, %v135_v56, 0  ;;  %vm10718_vm6 = vmmov 0  }
  0x3e   :  { %10802 = vst [vmem:[#allocation87_spill] sm:$0xff] %v9186_v44  ;;  %7885 = vmatprep.subr.bf16.mxu1 %v7884_v31  ;;  %10806 = vst [vmem:[#allocation91_spill] sm:$0xff] %v9196_v58  ;;  %v270_v62 = vsel %vm148_vm0, %v136_v61, 0  ;;  %v655_v21 = vsub.f32 %v9113_v2, %v9149_v40  ;;  %v9206_v38 = vand.u32 4294901760, %v9164_v17  ;;  %v9212_v20 = vsub.f32 %v258_v60, %v9173_v32  ;;  %v137_v60 = vld [vmem:[%s10469_s3 + $0x148] sm:$0xff] }
  0x3f   :  { %10804 = vst [vmem:[#allocation89_spill] sm:$0xff] %v9191_v6  ;;  %7887 = vmatpush3.bf16.msra.mxu1 %v7884_v31  ;;  %10807 = vst [vmem:[#allocation92_spill] sm:$0xff] %v9199_v4  ;;  %v9209_v31 = vand.u32 4294901760, %v9167_v43  ;;  %v646_v59 = vand.u32 4294901760, %v645_v10  ;;  %v665_v56 = vsub.f32 %v9152_v3, %v9186_v44  ;;  %v9220_v61 = vsub.f32 %v264_v29, %v9193_v50 }
  0x40   :  { %6843 = vmatmul.mubr.f32.gmra.mrb[24].mxu0 %v616_v53  ;;  %7323 = vmatmul.mubr.f32.gmra.mrb[24].mxu1 %v616_v53  ;;  %10808 = vst [vmem:[#allocation93_spill] sm:$0xff] %v9206_v38  ;;  %10810 = vst [vmem:[#allocation95_spill] sm:$0xff] %v9212_v20  ;;  %v9217_v53 = vsub.f32 %v261_v25, %v9188_v11  ;;  %v9222_v40 = vand.u32 4294901760, %v267_v54  ;;  %v9224_v2 = vand.u32 4294901760, %v270_v62  ;;  %v9233_v10 = vand.u32 4294901760, %v9196_v58 }
  0x41   :  { %10809 = vst [vmem:[#allocation94_spill] sm:$0xff] %v9209_v31  ;;  %6845 = vmatprep.mubr.f32.mxu0 %v626_v23  ;;  %7325 = vmatprep.mubr.f32.mxu1 %v626_v23  ;;  %10812 = vst [vmem:[#allocation97_spill] sm:$0xff] %v9220_v61  ;;  %v9230_v23 = vand.u32 4294901760, %v9191_v6  ;;  %v9236_v25 = vand.u32 4294901760, %v9199_v4  ;;  %v656_v29 = vand.u32 4294901760, %v655_v21  ;;  %v675_v44 = vsub.f32 %v9164_v17, %v9206_v38 }
  0x42   :  { %10811 = vst [vmem:[#allocation96_spill] sm:$0xff] %v9217_v53  ;;  %10813 = vst [vmem:[#allocation98_spill] sm:$0xff] %v9222_v40  ;;  %v685_v3 = vsub.f32 %v9167_v43, %v9209_v31  ;;  %v9243_v52 = vand.u32 4294901760, %v9212_v20  ;;  %v666_v50 = vand.u32 4294901760, %v665_v56  ;;  %v9246_v11 = vand.u32 4294901760, %v9217_v53  ;;  %v138_v31 = vld [vmem:[%s10469_s3 + $0x150] sm:$0xff] }
  0x43   :  { %10814 = vst [vmem:[#allocation99_spill] sm:$0xff] %v9224_v2  ;;  %10815 = vst [vmem:[#allocation100_spill] sm:$0xff] %v9230_v23  ;;  %v273_v32 = vsel %vm148_vm0, %v137_v60, 0  ;;  %v9253_v21 = vsub.f32 %v267_v54, %v9222_v40  ;;  %v9256_v38 = vsub.f32 %v270_v62, %v9224_v2  ;;  %v695_v56 = vsub.f32 %v9191_v6, %v9230_v23 }
  0x44   :  { %10816 = vst [vmem:[#allocation101_spill] sm:$0xff] %v9233_v10  ;;  %10817 = vst [vmem:[#allocation102_spill] sm:$0xff] %v9236_v25  ;;  %6846 = vmatmul.mubr.f32.gmra.mrb[26].mxu0 %v636_v5  ;;  %7326 = vmatmul.mubr.f32.gmra.mrb[26].mxu1 %v636_v5  ;;  %v9250_v5 = vand.u32 4294901760, %v9220_v61  ;;  %v705_v60 = vsub.f32 %v9196_v58, %v9233_v10  ;;  %v715_v54 = vsub.f32 %v9199_v4, %v9236_v25  ;;  %v141_v4 = vld [vmem:[%s10469_s3 + $0x168] sm:$0xff] }
  0x45   :  { %10818 = vst [vmem:[#allocation103_spill] sm:$0xff] %v9243_v52  ;;  %6848 = vmatprep.mubr.f32.mxu0 %v646_v59  ;;  %7328 = vmatprep.mubr.f32.mxu1 %v646_v59  ;;  %10819 = vst [vmem:[#allocation104_spill] sm:$0xff] %v9246_v11  ;;  %v139_v59 = vld [vmem:[%s10469_s3 + $0x158] sm:$0xff]  ;;  %v676_v62 = vand.u32 4294901760, %v675_v44  ;;  %v686_v43 = vand.u32 4294901760, %v685_v3  ;;  %v725_v17 = vsub.f32 %v9212_v20, %v9243_v52  ;;  %v9272_v2 = vand.u32 4294901760, %v273_v32 }
  0x46   :  { %10820 = vst [vmem:[#allocation105_spill] sm:$0xff] %v9250_v5  ;;  %10821 = vst [vmem:[#allocation106_spill] sm:$0xff] %v9253_v21  ;;  %v735_v23 = vsub.f32 %v9217_v53, %v9246_v11  ;;  %v276_v6 = vsel %vm148_vm0, %v138_v31, 0  ;;  %v279_v10 = vsel %vm148_vm0, %v139_v59, 0  ;;  %v10824_v25 = vand.u32 4294901760, %v8607_v0  ;;  %v140_v31 = vld [vmem:[%s10469_s3 + $0x160] sm:$0xff] }
  0x47   :  { %10822 = vst [vmem:[#allocation107_spill] sm:$0xff] %v9256_v38  ;;  %10823 = vst [vmem:[#allocation108_spill] sm:$0xff] %v9272_v2  ;;  %v745_v3 = vsub.f32 %v9220_v61, %v9250_v5  ;;  %v9286_v44 = vand.u32 4294901760, %v9253_v21  ;;  %v10827_v59 = vand.u32 4294901760, %v8612_v1  ;;  %v716_v52 = vand.u32 4294901760, %v715_v54 }
  0x48   :  { %6849 = vmatmul.mubr.f32.gmra.mrb[28].mxu0 %v656_v29  ;;  %7329 = vmatmul.mubr.f32.gmra.mrb[28].mxu1 %v656_v29  ;;  %v9281_v29 = vsub.f32 %v8607_v0, %v10824_v25  ;;  %v696_v0 = vand.u32 4294901760, %v695_v56  ;;  %v706_v25 = vand.u32 4294901760, %v705_v60  ;;  %v726_v61 = vand.u32 4294901760, %v725_v17  ;;  %v142_v17 = vld [vmem:[%s10469_s3 + $0x170] sm:$0xff] }
  0x49   :  { %6851 = vmatprep.mubr.f32.mxu0 %v666_v50  ;;  %7331 = vmatprep.mubr.f32.mxu1 %v666_v50  ;;  %10825 = vst [vmem:[#allocation109_spill] sm:$0xff] %v9286_v44  ;;  %v9289_v50 = vand.u32 4294901760, %v9256_v38  ;;  %v9297_v11 = vsub.f32 %v8612_v1, %v10827_v59  ;;  %v9301_v53 = vsub.f32 %v273_v32, %v9272_v2  ;;  %v9303_v20 = vand.u32 4294901760, %v276_v6 }
  0x4a   :  { %v10672_v5 = vand.u32 4294901760, %v9281_v29  ;;  %v736_v56 = vand.u32 4294901760, %v735_v23  ;;  %v9309_v60 = vand.u32 4294901760, %v279_v10  ;;  %v282_v54 = vsel %vm148_vm0, %v140_v31, 0 }
  0x4b   :  { %10826 = vst [vmem:[#allocation110_spill] sm:$0xff] %v9289_v50  ;;  %10828 = vst [vmem:[#allocation111_spill] sm:$0xff] %v9303_v20  ;;  %v10681_v1 = vand.u32 4294901760, %v9297_v11  ;;  %v755_v59 = vsub.f32 %v9253_v21, %v9286_v44  ;;  %v285_v31 = vsel %vm148_vm0, %v141_v4, 0  ;;  %v9339_v44 = vand.u32 4294901760, %v282_v54 }
  0x4c   :  { %6852 = vmatmul.mubr.f32.gmra.mrb[30].mxu0 %v676_v62  ;;  %7332 = vmatmul.mubr.f32.gmra.mrb[30].mxu1 %v676_v62  ;;  %10829 = vst [vmem:[#allocation112_spill] sm:$0xff] %v9309_v60  ;;  %v846_v32 = vsub.f32 %v9281_v29, %v10672_v5  ;;  %v746_v62 = vand.u32 4294901760, %v745_v3  ;;  %v10830_v5 = vand.u32 4294901760, %v8630_v7  ;;  %v10831_v3 = vand.u32 4294901760, %v8635_v8 }
  0x4d   :  { %6854 = vmatprep.mubr.f32.mxu0 %v686_v43  ;;  %7334 = vmatprep.mubr.f32.mxu1 %v686_v43  ;;  %v765_v43 = vsub.f32 %v9256_v38, %v9289_v50  ;;  %v853_v23 = vsub.f32 %v9297_v11, %v10681_v1  ;;  %v9337_v50 = vsub.f32 %v276_v6, %v9303_v20  ;;  %v288_v4 = vsel %vm148_vm0, %v142_v17, 0 }
  0x4e   :  { %v847_v58 = vand.u32 4294901760, %v846_v32  ;;  %v9329_v2 = vsub.f32 %v8630_v7, %v10830_v5  ;;  %v9334_v40 = vsub.f32 %v8635_v8, %v10831_v3  ;;  %10832 = vst [vmem:[#allocation113_spill] sm:$0xff] %v9339_v44  ;;  %v143_v7 = vld [vmem:[%s10469_s3 + $0x178] sm:$0xff]  ;;  %v10834_v32 = vand.u32 4294901760, %v8648_v13 }
  0x4f   :  { %v854_v1 = vand.u32 4294901760, %v853_v23  ;;  %v9361_v17 = vsub.f32 %v279_v10, %v9309_v60  ;;  %v9363_v3 = vand.u32 4294901760, %v285_v31  ;;  %v9374_v10 = vand.u32 4294901760, %v9337_v50 }
  0x50   :  { %6855 = vmatmul.mubr.f32.gmra.mrb[32].mxu0 %v696_v0  ;;  %7335 = vmatmul.mubr.f32.gmra.mrb[32].mxu1 %v696_v0  ;;  %v10833_v0 = vand.u32 4294901760, %v8643_v12  ;;  %v9355_v23 = vsub.f32 %v8648_v13, %v10834_v32  ;;  %v10836_v8 = vand.u32 4294901760, %v9329_v2  ;;  %v9377_v21 = vsub.f32 %v282_v54, %v9339_v44 }
  0x51   :  { %6857 = vmatprep.mubr.f32.mxu0 %v706_v25  ;;  %7337 = vmatprep.mubr.f32.mxu1 %v706_v25  ;;  %v9358_v25 = vand.u32 4294901760, %v9301_v53  ;;  %10835 = vst [vmem:[#allocation114_spill] sm:$0xff] %v9363_v3  ;;  %v7836_v5 = vpack.c.bf16 %v854_v1, %v847_v58  ;;  %v9379_v58 = vand.u32 4294901760, %v288_v4  ;;  %v291_v1 = vsel %vm148_vm0, %v143_v7, 0 }
  0x52   :  { %v9350_v6 = vsub.f32 %v8643_v12, %v10833_v0  ;;  %v860_v38 = vsub.f32 %v9329_v2, %v10836_v8  ;;  %v10837_v12 = vand.u32 4294901760, %v9334_v40  ;;  %v756_v20 = vand.u32 4294901760, %v755_v59 }
  0x53   :  { %10838 = vst [vmem:[#allocation115_spill] sm:$0xff] %v9379_v58  ;;  %7837 = vmatprep.subr.bf16.mxu0 %v7836_v5  ;;  %v766_v54 = vand.u32 4294901760, %v765_v43  ;;  %v9394_v7 = vsub.f32 %v285_v31, %v9363_v3  ;;  %v785_v59 = vsub.f32 %v9337_v50, %v9374_v10  ;;  %v7892_v31 = vpack.c.bf16 %v9102_v47, %v9097_v26 }
  0x54   :  { %v867_v0 = vsub.f32 %v9334_v40, %v10837_v12  ;;  %v10696_v13 = vand.u32 4294901760, %v9350_v6  ;;  %6858 = vmatmul.mubr.f32.gmra.mrb[34].mxu0 %v716_v52  ;;  %7338 = vmatmul.mubr.f32.gmra.mrb[34].mxu1 %v716_v52  ;;  %v861_v8 = vand.u32 4294901760, %v860_v38  ;;  %v10839_v52 = vand.u32 4294901760, %v9355_v23 }
  0x55   :  { %6860 = vmatprep.mubr.f32.mxu0 %v726_v61  ;;  %7340 = vmatprep.mubr.f32.mxu1 %v726_v61  ;;  %v775_v38 = vsub.f32 %v9301_v53, %v9358_v25  ;;  %v9391_v61 = vand.u32 4294901760, %v9361_v17 }
  0x56   :  { %v868_v12 = vand.u32 4294901760, %v867_v0  ;;  %v3370_v32 = vsub.f32 %v9350_v6, %v10696_v13  ;;  %v3377_v60 = vsub.f32 %v9355_v23, %v10839_v52  ;;  %7839 = vmatpush3.bf16.msra.mxu0 %v7836_v5  ;;  %v9396_v0 = vand.u32 4294901760, %v291_v1  ;;  %v10854_v13 = vld [vmem:[#allocation86_spill] sm:$0xff] }
  0x57   :  { %v7844_v5 = vpack.c.bf16 %v9297_v11, %v9281_v29 }
  0x58   :  { %v7840_v44 = vpack.c.bf16 %v868_v12, %v861_v8  ;;  %v3371_v33 = vand.u32 4294901760, %v3370_v32  ;;  %v3378_v36 = vand.u32 4294901760, %v3377_v60  ;;  %6861 = vmatmul.mubr.f32.gmra.mrb[36].mxu0 %v736_v56  ;;  %7341 = vmatmul.mubr.f32.gmra.mrb[36].mxu1 %v736_v56  ;;  %10840 = vst [vmem:[#allocation116_spill] sm:$0xff] %v9396_v0  ;;  %v9401_v60 = vand.u32 4294901760, %v9377_v21 }
  0x59   :  { %6863 = vmatprep.mubr.f32.mxu0 %v746_v62  ;;  %7343 = vmatprep.mubr.f32.mxu1 %v746_v62  ;;  %v9404_v56 = vsub.f32 %v288_v4, %v9379_v58  ;;  %v776_v62 = vand.u32 4294901760, %v775_v38  ;;  %v795_v32 = vsub.f32 %v9361_v17, %v9391_v61  ;;  %v9413_v8 = vand.u32 4294901760, %v9394_v7 }
  0x5a   :  { %v7888_v43 = vpack.c.bf16 %v3378_v36, %v3371_v33  ;;  %7841 = vmatprep.subr.bf16.mxu0 %v7840_v44  ;;  %v9416_v36 = vsub.f32 %v291_v1, %v9396_v0  ;;  %v786_v33 = vand.u32 4294901760, %v785_v59 }
  0x5b   :  { %7843 = vmatpush3.bf16.msra.mxu0 %v7840_v44  ;;  %v805_v44 = vsub.f32 %v9377_v21, %v9401_v60  ;;  %v9421_v4 = vand.u32 4294901760, %v9404_v56  ;;  %v815_v12 = vsub.f32 %v9394_v7, %v9413_v8 }
  0x5c   :  { %7889 = vmatprep.subr.bf16.mxu1 %v7888_v43  ;;  %6864 = vmatmul.mubr.f32.gmra.mrb[38].mxu0 %v756_v20  ;;  %v9426_v1 = vand.u32 4294901760, %v9416_v36 }
  0x5d   :  { %7344 = vmatmul.mubr.f32.gmra.mrb[38].mxu1 %v756_v20  ;;  %6866 = vmatprep.mubr.f32.mxu0 %v766_v54  ;;  %v796_v20 = vand.u32 4294901760, %v795_v32  ;;  %v806_v52 = vand.u32 4294901760, %v805_v44  ;;  %v816_v38 = vand.u32 4294901760, %v815_v12  ;;  %v7848_v32 = vpack.c.bf16 %v9334_v40, %v9329_v2  ;;  %v10843_v44 = vld [vmem:[#allocation53_spill] sm:$0xff]  ;;  %v10845_v12 = vld [vmem:[#allocation59_spill] sm:$0xff] }
  0x5e   :  { %7346 = vmatprep.mubr.f32.mxu1 %v766_v54  ;;  %7891 = vmatpush3.bf16.msra.mxu1 %v7888_v43  ;;  %v825_v54 = vsub.f32 %v9404_v56, %v9421_v4  ;;  %v835_v59 = vsub.f32 %v9416_v36, %v9426_v1 }
  0x5f   :  { %7845 = vmatprep.subr.bf16.mxu0 %v7844_v5  ;;  %7893 = vmatprep.subr.bf16.mxu1 %v7892_v31 }
  0x60   :  { %6867 = vmatmul.mubr.f32.gmra.mrb[40].mxu0 %v776_v62  ;;  %v826_v43 = vand.u32 4294901760, %v825_v54  ;;  %v10847_v54 = vld [vmem:[#allocation67_spill] sm:$0xff] }
  0x61   :  { %7347 = vmatmul.mubr.f32.gmra.mrb[40].mxu1 %v776_v62  ;;  %6869 = vmatprep.mubr.f32.mxu0 %v786_v33  ;;  %v836_v62 = vand.u32 4294901760, %v835_v59  ;;  %v10849_v59 = vld [vmem:[#allocation75_spill] sm:$0xff] }
  0x62   :  { %7349 = vmatprep.mubr.f32.mxu1 %v786_v33  ;;  %v7896_v33 = vpack.c.bf16 %v9355_v23, %v9350_v6 }
  0x64   :  { %6870 = vmatmul.mubr.f32.gmra.mrb[42].mxu0 %v796_v20 }
  0x65   :  { %7350 = vmatmul.mubr.f32.gmra.mrb[42].mxu1 %v796_v20  ;;  %6872 = vmatprep.mubr.f32.mxu0 %v806_v52  ;;  %v10844_v20 = vld [vmem:[#allocation57_spill] sm:$0xff] }
  0x66   :  { %7352 = vmatprep.mubr.f32.mxu1 %v806_v52  ;;  %v10846_v52 = vld [vmem:[#allocation64_spill] sm:$0xff] }
  0x68   :  { %6873 = vmatmul.mubr.f32.gmra.mrb[44].mxu0 %v816_v38 }
  0x69   :  { %7353 = vmatmul.mubr.f32.gmra.mrb[44].mxu1 %v816_v38  ;;  %6875 = vmatprep.mubr.f32.mxu0 %v826_v43  ;;  %v10848_v38 = vld [vmem:[#allocation70_spill] sm:$0xff] }
  0x6a   :  { %7355 = vmatprep.mubr.f32.mxu1 %v826_v43  ;;  %v10850_v43 = vld [vmem:[#allocation77_spill] sm:$0xff] }
  0x6c   :  { %6876 = vmatmul.mubr.f32.gmra.mrb[46].mxu0 %v836_v62 }
  0x6d   :  { %7356 = vmatmul.mubr.f32.gmra.mrb[46].mxu1 %v836_v62  ;;  %6886 = vmatprep.mubr.f32.mxu0 %v8683_v24  ;;  %v10851_v62 = vld [vmem:[#allocation78_spill] sm:$0xff] }
  0x6e   :  { %7366 = vmatprep.mubr.f32.mxu1 %v8683_v24 }
  0x70   :  { %6887 = vmatmul.mubr.f32.vlgmr.msra.gmra.mrb[0].mxu0 %v8702_v30 }
  0x71   :  { %7367 = vmatmul.mubr.f32.vlgmr.msra.gmra.mrb[0].mxu1 %v8702_v30  ;;  %6889 = vmatprep.mubr.f32.mxu0 %v8711_v34 }
  0x72   :  { %7369 = vmatprep.mubr.f32.mxu1 %v8711_v34  ;;  %7895 = vmatpush3.bf16.msra.mxu1 %v7892_v31  ;;  %v10842_v31 = vld [vmem:[#allocation50_spill] sm:$0xff] }
  0x73   :  { %7847 = vmatpush3.bf16.msra.mxu0 %v7844_v5  ;;  %7897 = vmatprep.subr.bf16.mxu1 %v7896_v33  ;;  %v10841_v5 = vld [vmem:[#allocation46_spill] sm:$0xff] }
  0x74   :  { %7849 = vmatprep.subr.bf16.mxu0 %v7848_v32  ;;  %6890 = vmatmul.mubr.f32.gmra.mrb[2].mxu0 %v8713_v35 }
  0x75   :  { %7370 = vmatmul.mubr.f32.gmra.mrb[2].mxu1 %v8713_v35  ;;  %6892 = vmatprep.mubr.f32.mxu0 %v8724_v39 }
  0x76   :  { %7372 = vmatprep.mubr.f32.mxu1 %v8724_v39  ;;  %7899 = vmatpush3.bf16.msra.mxu1 %v7896_v33  ;;  %v10853_v33 = vld [vmem:[#allocation85_spill] sm:$0xff] }
  0x77   :  { %7851 = vmatpush3.bf16.msra.mxu0 %v7848_v32  ;;  %7901 = vmatprep.subr.bf16.mxu1 %v8675_v22  ;;  %v10852_v32 = vld [vmem:[#allocation84_spill] sm:$0xff] }
  0x78   :  { %7853 = vmatprep.subr.bf16.mxu0 %v8657_v15  ;;  %6893 = vmatmul.mubr.f32.gmra.mrb[4].mxu0 %v8738_v45 }
  0x79   :  { %7373 = vmatmul.mubr.f32.gmra.mrb[4].mxu1 %v8738_v45  ;;  %6895 = vmatprep.mubr.f32.mxu0 %v8746_v48 }
  0x7a   :  { %7375 = vmatprep.mubr.f32.mxu1 %v8746_v48 }
  0x7c   :  { %6896 = vmatmul.mubr.f32.gmra.mrb[6].mxu0 %v8770_v57 }
  0x7d   :  { %7376 = vmatmul.mubr.f32.gmra.mrb[6].mxu1 %v8770_v57  ;;  %6898 = vmatprep.mubr.f32.mxu0 %v8807_v37 }
  0x7e   :  { %7378 = vmatprep.mubr.f32.mxu1 %v8807_v37 }
  0x80   :  { %6899 = vmatmul.mubr.f32.gmra.mrb[8].mxu0 %v8821_v63 }
  0x81   :  { %7379 = vmatmul.mubr.f32.gmra.mrb[8].mxu1 %v8821_v63  ;;  %6901 = vmatprep.mubr.f32.mxu0 %v8826_v16 }
  0x82   :  { %7381 = vmatprep.mubr.f32.mxu1 %v8826_v16 }
  0x84   :  { %6902 = vmatmul.mubr.f32.gmra.mrb[10].mxu0 %v8828_v14 }
  0x85   :  { %7382 = vmatmul.mubr.f32.gmra.mrb[10].mxu1 %v8828_v14  ;;  %6904 = vmatprep.mubr.f32.mxu0 %v8840_v28 }
  0x86   :  { %7384 = vmatprep.mubr.f32.mxu1 %v8840_v28 }
  0x88   :  { %6905 = vmatmul.mubr.f32.gmra.mrb[12].mxu0 %v8851_v41 }
  0x89   :  { %7385 = vmatmul.mubr.f32.gmra.mrb[12].mxu1 %v8851_v41  ;;  %6907 = vmatprep.mubr.f32.mxu0 %v8862_v49 }
  0x8a   :  { %7387 = vmatprep.mubr.f32.mxu1 %v8862_v49 }
  0x8c   :  { %6908 = vmatmul.mubr.f32.gmra.mrb[14].mxu0 %v8887_v18 }
  0x8d   :  { %7388 = vmatmul.mubr.f32.gmra.mrb[14].mxu1 %v8887_v18  ;;  %6910 = vmatprep.mubr.f32.mxu0 %v8909_v55 }
  0x8e   :  { %7390 = vmatprep.mubr.f32.mxu1 %v8909_v55 }
  0x90   :  { %6911 = vmatmul.mubr.f32.gmra.mrb[16].mxu0 %v8918_v46 }
  0x91   :  { %7391 = vmatmul.mubr.f32.gmra.mrb[16].mxu1 %v8918_v46  ;;  %6913 = vmatprep.mubr.f32.mxu0 %v8930_v42 }
  0x92   :  { %7393 = vmatprep.mubr.f32.mxu1 %v8930_v42 }
  0x94   :  { %6914 = vmatmul.mubr.f32.gmra.mrb[18].mxu0 %v8942_v27 }
  0x95   :  { %7394 = vmatmul.mubr.f32.gmra.mrb[18].mxu1 %v8942_v27  ;;  %6916 = vmatprep.mubr.f32.mxu0 %v8953_v9 }
  0x96   :  { %7396 = vmatprep.mubr.f32.mxu1 %v8953_v9 }
  0x98   :  { %6917 = vmatmul.mubr.f32.gmra.mrb[20].mxu0 %v8964_v51 }
  0x99   :  { %7397 = vmatmul.mubr.f32.gmra.mrb[20].mxu1 %v8964_v51  ;;  %6919 = vmatprep.mubr.f32.mxu0 %v10841_v5 }
  0x9a   :  { %7399 = vmatprep.mubr.f32.mxu1 %v10841_v5 }
  0x9c   :  { %6920 = vmatmul.mubr.f32.gmra.mrb[22].mxu0 %v10842_v31 }
  0x9d   :  { %7400 = vmatmul.mubr.f32.gmra.mrb[22].mxu1 %v10842_v31  ;;  %6922 = vmatprep.mubr.f32.mxu0 %v10843_v44 }
  0x9e   :  { %7402 = vmatprep.mubr.f32.mxu1 %v10843_v44 }
  0xa0   :  { %6923 = vmatmul.mubr.f32.gmra.mrb[24].mxu0 %v10844_v20 }
  0xa1   :  { %7403 = vmatmul.mubr.f32.gmra.mrb[24].mxu1 %v10844_v20  ;;  %6925 = vmatprep.mubr.f32.mxu0 %v10845_v12 }
  0xa2   :  { %7405 = vmatprep.mubr.f32.mxu1 %v10845_v12 }
  0xa4   :  { %6926 = vmatmul.mubr.f32.gmra.mrb[26].mxu0 %v10846_v52 }
  0xa5   :  { %7406 = vmatmul.mubr.f32.gmra.mrb[26].mxu1 %v10846_v52  ;;  %6928 = vmatprep.mubr.f32.mxu0 %v10847_v54 }
  0xa6   :  { %7408 = vmatprep.mubr.f32.mxu1 %v10847_v54 }
  0xa8   :  { %6929 = vmatmul.mubr.f32.gmra.mrb[28].mxu0 %v10848_v38 }
  0xa9   :  { %7409 = vmatmul.mubr.f32.gmra.mrb[28].mxu1 %v10848_v38  ;;  %6931 = vmatprep.mubr.f32.mxu0 %v10849_v59 }
  0xaa   :  { %7411 = vmatprep.mubr.f32.mxu1 %v10849_v59 }
  0xac   :  { %6932 = vmatmul.mubr.f32.gmra.mrb[30].mxu0 %v10850_v43 }
  0xad   :  { %7412 = vmatmul.mubr.f32.gmra.mrb[30].mxu1 %v10850_v43  ;;  %6934 = vmatprep.mubr.f32.mxu0 %v10851_v62  ;;  %v10855_v43 = vld [vmem:[#allocation88_spill] sm:$0xff] }
  0xae   :  { %7414 = vmatprep.mubr.f32.mxu1 %v10851_v62  ;;  %v10856_v62 = vld [vmem:[#allocation90_spill] sm:$0xff] }
  0xb0   :  { %6935 = vmatmul.mubr.f32.gmra.mrb[32].mxu0 %v9160_v19 }
  0xb1   :  { %7415 = vmatmul.mubr.f32.gmra.mrb[32].mxu1 %v9160_v19  ;;  %6937 = vmatprep.mubr.f32.mxu0 %v10852_v32  ;;  %v10857_v19 = vld [vmem:[#allocation98_spill] sm:$0xff] }
  0xb2   :  { %7417 = vmatprep.mubr.f32.mxu1 %v10852_v32  ;;  %v10858_v32 = vld [vmem:[#allocation99_spill] sm:$0xff] }
  0xb4   :  { %6938 = vmatmul.mubr.f32.gmra.mrb[34].mxu0 %v10853_v33 }
  0xb5   :  { %7418 = vmatmul.mubr.f32.gmra.mrb[34].mxu1 %v10853_v33  ;;  %6940 = vmatprep.mubr.f32.mxu0 %v10854_v13  ;;  %v10859_v33 = vld [vmem:[#allocation108_spill] sm:$0xff] }
  0xb6   :  { %7420 = vmatprep.mubr.f32.mxu1 %v10854_v13  ;;  %v10860_v13 = vld [vmem:[#allocation111_spill] sm:$0xff] }
  0xb8   :  { %6941 = vmatmul.mubr.f32.gmra.mrb[36].mxu0 %v10855_v43 }
  0xb9   :  { %7421 = vmatmul.mubr.f32.gmra.mrb[36].mxu1 %v10855_v43  ;;  %6943 = vmatprep.mubr.f32.mxu0 %v10856_v62  ;;  %v10861_v43 = vld [vmem:[#allocation112_spill] sm:$0xff] }
  0xba   :  { %7423 = vmatprep.mubr.f32.mxu1 %v10856_v62  ;;  %v10862_v62 = vld [vmem:[#allocation113_spill] sm:$0xff] }
  0xbc   :  { %6944 = vmatmul.mubr.f32.gmra.mrb[38].mxu0 %v10857_v19 }
  0xbd   :  { %7424 = vmatmul.mubr.f32.gmra.mrb[38].mxu1 %v10857_v19  ;;  %6946 = vmatprep.mubr.f32.mxu0 %v10858_v32 }
  0xbe   :  { %7426 = vmatprep.mubr.f32.mxu1 %v10858_v32  ;;  %v10875_v32 = vld [vmem:[#allocation28_spill] sm:$0xff] }
  0xc0   :  { %6947 = vmatmul.mubr.f32.gmra.mrb[40].mxu0 %v10859_v33 }
  0xc1   :  { %7427 = vmatmul.mubr.f32.gmra.mrb[40].mxu1 %v10859_v33  ;;  %6949 = vmatprep.mubr.f32.mxu0 %v10860_v13  ;;  %v10872_v33 = vld [vmem:[#allocation23_spill] sm:$0xff] }
  0xc2   :  { %7429 = vmatprep.mubr.f32.mxu1 %v10860_v13  ;;  %v10863_v13 = vld [vmem:[#allocation9_spill] sm:$0xff] }
  0xc4   :  { %6950 = vmatmul.mubr.f32.gmra.mrb[42].mxu0 %v10861_v43 }
  0xc5   :  { %7430 = vmatmul.mubr.f32.gmra.mrb[42].mxu1 %v10861_v43  ;;  %6952 = vmatprep.mubr.f32.mxu0 %v10862_v62  ;;  %v10864_v43 = vld [vmem:[#allocation10_spill] sm:$0xff] }
  0xc6   :  { %7432 = vmatprep.mubr.f32.mxu1 %v10862_v62  ;;  %v10865_v62 = vld [vmem:[#allocation12_spill] sm:$0xff] }
  0xc8   :  { %6953 = vmatmul.mubr.f32.gmra.mrb[44].mxu0 %v9363_v3 }
  0xc9   :  { %7433 = vmatmul.mubr.f32.gmra.mrb[44].mxu1 %v9363_v3  ;;  %6955 = vmatprep.mubr.f32.mxu0 %v9379_v58  ;;  %v10867_v3 = vld [vmem:[#allocation8_spill] sm:$0xff] }
  0xca   :  { %7435 = vmatprep.mubr.f32.mxu1 %v9379_v58  ;;  %v10866_v58 = vld [vmem:[#allocation7_spill] sm:$0xff] }
  0xcc   :  { %6956 = vmatmul.mubr.f32.gmra.mrb[46].mxu0 %v9396_v0 }
  0xcd   :  { %7436 = vmatmul.mubr.f32.gmra.mrb[46].mxu1 %v9396_v0  ;;  %6966 = vmatprep.mubr.f32.mxu0 %v10863_v13  ;;  %v10868_v0 = vld [vmem:[#allocation13_spill] sm:$0xff] }
  0xce   :  { %7446 = vmatprep.mubr.f32.mxu1 %v10863_v13  ;;  %v10869_v13 = vld [vmem:[#allocation15_spill] sm:$0xff] }
  0xd0   :  { %6967 = vmatmul.mubr.f32.vlgmr.msra.gmra.mrb[0].mxu0 %v10864_v43 }
  0xd1   :  { %7447 = vmatmul.mubr.f32.vlgmr.msra.gmra.mrb[0].mxu1 %v10864_v43  ;;  %6969 = vmatprep.mubr.f32.mxu0 %v10865_v62  ;;  %v10870_v43 = vld [vmem:[#allocation18_spill] sm:$0xff] }
  0xd2   :  { %7449 = vmatprep.mubr.f32.mxu1 %v10865_v62  ;;  %7903 = vmatpush3.bf16.msra.mxu1 %v8675_v22  ;;  %v10871_v62 = vld [vmem:[#allocation20_spill] sm:$0xff] }
  0xd3   :  { %7855 = vmatpush3.bf16.msra.mxu0 %v8657_v15  ;;  %7905 = vmatprep.subr.bf16.mxu1 %v10867_v3 }
  0xd4   :  { %7857 = vmatprep.subr.bf16.mxu0 %v10866_v58  ;;  %6970 = vmatmul.mubr.f32.gmra.mrb[2].mxu0 %v10868_v0 }
  0xd5   :  { %7450 = vmatmul.mubr.f32.gmra.mrb[2].mxu1 %v10868_v0  ;;  %6972 = vmatprep.mubr.f32.mxu0 %v10869_v13  ;;  %v10873_v0 = vld [vmem:[#allocation25_spill] sm:$0xff] }
  0xd6   :  { %7452 = vmatprep.mubr.f32.mxu1 %v10869_v13  ;;  %7907 = vmatpush3.bf16.msra.mxu1 %v10867_v3  ;;  %v10874_v13 = vld [vmem:[#allocation27_spill] sm:$0xff] }
  0xd7   :  { %7859 = vmatpush3.bf16.msra.mxu0 %v10866_v58 }
  0xd8   :  { %6973 = vmatmul.mubr.f32.gmra.mrb[4].mxu0 %v10870_v43 }
  0xd9   :  { %7453 = vmatmul.mubr.f32.gmra.mrb[4].mxu1 %v10870_v43  ;;  %6975 = vmatprep.mubr.f32.mxu0 %v10871_v62  ;;  %v10876_v43 = vld [vmem:[#allocation29_spill] sm:$0xff] }
  0xda   :  { %7455 = vmatprep.mubr.f32.mxu1 %v10871_v62  ;;  %v10877_v62 = vld [vmem:[#allocation31_spill] sm:$0xff] }
  0xdc   :  { %6976 = vmatmul.mubr.f32.gmra.mrb[6].mxu0 %v10872_v33 }
  0xdd   :  { %7456 = vmatmul.mubr.f32.gmra.mrb[6].mxu1 %v10872_v33  ;;  %6978 = vmatprep.mubr.f32.mxu0 %v10873_v0  ;;  %v10878_v33 = vld [vmem:[#allocation34_spill] sm:$0xff] }
  0xde   :  { %7458 = vmatprep.mubr.f32.mxu1 %v10873_v0  ;;  %v10879_v0 = vld [vmem:[#allocation36_spill] sm:$0xff] }
  0xe0   :  { %6979 = vmatmul.mubr.f32.gmra.mrb[8].mxu0 %v10874_v13 }
  0xe1   :  { %7459 = vmatmul.mubr.f32.gmra.mrb[8].mxu1 %v10874_v13  ;;  %6981 = vmatprep.mubr.f32.mxu0 %v10875_v32  ;;  %v10880_v13 = vld [vmem:[#allocation38_spill] sm:$0xff] }
  0xe2   :  { %7461 = vmatprep.mubr.f32.mxu1 %v10875_v32  ;;  %v10881_v32 = vld [vmem:[#allocation41_spill] sm:$0xff] }
  0xe4   :  { %6982 = vmatmul.mubr.f32.gmra.mrb[10].mxu0 %v10876_v43 }
  0xe5   :  { %7462 = vmatmul.mubr.f32.gmra.mrb[10].mxu1 %v10876_v43  ;;  %6984 = vmatprep.mubr.f32.mxu0 %v10877_v62  ;;  %v10882_v43 = vand.u32 4294901760, %v9097_v26  ;;  %v10888_v26 = vld [vmem:[#allocation51_spill] sm:$0xff] }
  0xe6   :  { %7464 = vmatprep.mubr.f32.mxu1 %v10877_v62  ;;  %v10883_v62 = vand.u32 4294901760, %v9102_v47  ;;  %v10889_v47 = vld [vmem:[#allocation52_spill] sm:$0xff] }
  0xe8   :  { %6985 = vmatmul.mubr.f32.gmra.mrb[12].mxu0 %v10878_v33  ;;  %v9578_v19 = vpack.c.bf16 %v10883_v62, %v10882_v43  ;;  %v10890_v43 = vld [vmem:[#allocation55_spill] sm:$0xff]  ;;  %v10891_v62 = vld [vmem:[#allocation58_spill] sm:$0xff] }
  0xe9   :  { %7465 = vmatmul.mubr.f32.gmra.mrb[12].mxu1 %v10878_v33  ;;  %6987 = vmatprep.mubr.f32.mxu0 %v10879_v0  ;;  %v10884_v33 = vld [vmem:[#allocation42_spill] sm:$0xff] }
  0xea   :  { %7467 = vmatprep.mubr.f32.mxu1 %v10879_v0  ;;  %7909 = vmatprep.subr.bf16.mxu1 %v9578_v19  ;;  %v10885_v0 = vld [vmem:[#allocation44_spill] sm:$0xff] }
  0xec   :  { %6988 = vmatmul.mubr.f32.gmra.mrb[14].mxu0 %v10880_v13 }
  0xed   :  { %7468 = vmatmul.mubr.f32.gmra.mrb[14].mxu1 %v10880_v13  ;;  %6990 = vmatprep.mubr.f32.mxu0 %v10881_v32  ;;  %v10886_v13 = vld [vmem:[#allocation47_spill] sm:$0xff] }
  0xee   :  { %7470 = vmatprep.mubr.f32.mxu1 %v10881_v32  ;;  %v10887_v32 = vld [vmem:[#allocation49_spill] sm:$0xff] }
  0xf0   :  { %6991 = vmatmul.mubr.f32.gmra.mrb[16].mxu0 %v10884_v33 }
  0xf1   :  { %7471 = vmatmul.mubr.f32.gmra.mrb[16].mxu1 %v10884_v33  ;;  %6993 = vmatprep.mubr.f32.mxu0 %v10885_v0  ;;  %v10892_v33 = vld [vmem:[#allocation63_spill] sm:$0xff] }
  0xf2   :  { %7473 = vmatprep.mubr.f32.mxu1 %v10885_v0  ;;  %v10893_v0 = vld [vmem:[#allocation66_spill] sm:$0xff] }
  0xf4   :  { %6994 = vmatmul.mubr.f32.gmra.mrb[18].mxu0 %v10886_v13 }
  0xf5   :  { %7474 = vmatmul.mubr.f32.gmra.mrb[18].mxu1 %v10886_v13  ;;  %6996 = vmatprep.mubr.f32.mxu0 %v10887_v32  ;;  %v10894_v13 = vld [vmem:[#allocation69_spill] sm:$0xff] }
  0xf6   :  { %7476 = vmatprep.mubr.f32.mxu1 %v10887_v32  ;;  %v10895_v32 = vld [vmem:[#allocation72_spill] sm:$0xff] }
  0xf8   :  { %6997 = vmatmul.mubr.f32.gmra.mrb[20].mxu0 %v10888_v26 }
  0xf9   :  { %7477 = vmatmul.mubr.f32.gmra.mrb[20].mxu1 %v10888_v26  ;;  %6999 = vmatprep.mubr.f32.mxu0 %v10889_v47  ;;  %v10896_v26 = vand.u32 4294901760, %v9281_v29  ;;  %v10902_v29 = vld [vmem:[#allocation89_spill] sm:$0xff] }
  0xfa   :  { %7479 = vmatprep.mubr.f32.mxu1 %v10889_v47  ;;  %v10897_v47 = vand.u32 4294901760, %v9297_v11  ;;  %v10903_v11 = vld [vmem:[#allocation91_spill] sm:$0xff] }
  0xfc   :  { %7000 = vmatmul.mubr.f32.gmra.mrb[22].mxu0 %v10890_v43 }
  0xfd   :  { %7480 = vmatmul.mubr.f32.gmra.mrb[22].mxu1 %v10890_v43  ;;  %7002 = vmatprep.mubr.f32.mxu0 %v10891_v62  ;;  %v7860_v43 = vpack.c.bf16 %v10897_v47, %v10896_v26  ;;  %v10905_v26 = vld [vmem:[#allocation95_spill] sm:$0xff]  ;;  %v10906_v47 = vld [vmem:[#allocation96_spill] sm:$0xff] }
  0xfe   :  { %7482 = vmatprep.mubr.f32.mxu1 %v10891_v62  ;;  %v10898_v62 = vld [vmem:[#allocation74_spill] sm:$0xff] }
  0xff   :  { %7861 = vmatprep.subr.bf16.mxu0 %v7860_v43 }
 0x100   :  { %7003 = vmatmul.mubr.f32.gmra.mrb[24].mxu0 %v10892_v33 }
 0x101   :  { %7483 = vmatmul.mubr.f32.gmra.mrb[24].mxu1 %v10892_v33  ;;  %7005 = vmatprep.mubr.f32.mxu0 %v10893_v0  ;;  %v10899_v33 = vld [vmem:[#allocation80_spill] sm:$0xff] }
 0x102   :  { %7485 = vmatprep.mubr.f32.mxu1 %v10893_v0  ;;  %v10900_v0 = vld [vmem:[#allocation82_spill] sm:$0xff] }
 0x104   :  { %7006 = vmatmul.mubr.f32.gmra.mrb[26].mxu0 %v10894_v13 }
 0x105   :  { %7486 = vmatmul.mubr.f32.gmra.mrb[26].mxu1 %v10894_v13  ;;  %7008 = vmatprep.mubr.f32.mxu0 %v10895_v32  ;;  %v10901_v13 = vld [vmem:[#allocation83_spill] sm:$0xff] }
 0x106   :  { %7488 = vmatprep.mubr.f32.mxu1 %v10895_v32  ;;  %v10904_v32 = vld [vmem:[#allocation92_spill] sm:$0xff] }
 0x108   :  { %7009 = vmatmul.mubr.f32.gmra.mrb[28].mxu0 %v10898_v62 }
 0x109   :  { %7489 = vmatmul.mubr.f32.gmra.mrb[28].mxu1 %v10898_v62  ;;  %7011 = vmatprep.mubr.f32.mxu0 %v10899_v33  ;;  %v10907_v62 = vld [vmem:[#allocation97_spill] sm:$0xff] }
 0x10a   :  { %7491 = vmatprep.mubr.f32.mxu1 %v10899_v33  ;;  %v10908_v33 = vld [vmem:[#allocation106_spill] sm:$0xff] }
 0x10c   :  { %7012 = vmatmul.mubr.f32.gmra.mrb[30].mxu0 %v10900_v0 }
 0x10d   :  { %7492 = vmatmul.mubr.f32.gmra.mrb[30].mxu1 %v10900_v0  ;;  %7014 = vmatprep.mubr.f32.mxu0 %v10901_v13  ;;  %v10909_v0 = vld [vmem:[#allocation107_spill] sm:$0xff] }
 0x10e   :  { %7494 = vmatprep.mubr.f32.mxu1 %v10901_v13  ;;  %v10913_v13 = vand.u32 4294901760, %v9350_v6  ;;  %v10919_v6 = vld [vmem:[#allocation21_spill] sm:$0xff] }
 0x110   :  { %7015 = vmatmul.mubr.f32.gmra.mrb[32].mxu0 %v10902_v29 }
 0x111   :  { %7495 = vmatmul.mubr.f32.gmra.mrb[32].mxu1 %v10902_v29  ;;  %7017 = vmatprep.mubr.f32.mxu0 %v10903_v11 }
 0x112   :  { %7497 = vmatprep.mubr.f32.mxu1 %v10903_v11  ;;  %v10915_v11 = vld [vmem:[#allocation14_spill] sm:$0xff] }
 0x114   :  { %7018 = vmatmul.mubr.f32.gmra.mrb[34].mxu0 %v10904_v32 }
 0x115   :  { %7498 = vmatmul.mubr.f32.gmra.mrb[34].mxu1 %v10904_v32  ;;  %7020 = vmatprep.mubr.f32.mxu0 %v10905_v26  ;;  %v10924_v32 = vld [vmem:[#allocation32_spill] sm:$0xff] }
 0x116   :  { %7500 = vmatprep.mubr.f32.mxu1 %v10905_v26  ;;  %v10925_v26 = vld [vmem:[#allocation33_spill] sm:$0xff] }
 0x118   :  { %7021 = vmatmul.mubr.f32.gmra.mrb[36].mxu0 %v10906_v47 }
 0x119   :  { %7501 = vmatmul.mubr.f32.gmra.mrb[36].mxu1 %v10906_v47  ;;  %7023 = vmatprep.mubr.f32.mxu0 %v10907_v62  ;;  %v10926_v47 = vld [vmem:[#allocation35_spill] sm:$0xff] }
 0x11a   :  { %7503 = vmatprep.mubr.f32.mxu1 %v10907_v62  ;;  %v10927_v62 = vld [vmem:[#allocation37_spill] sm:$0xff] }
 0x11c   :  { %7024 = vmatmul.mubr.f32.gmra.mrb[38].mxu0 %v10908_v33 }
 0x11d   :  { %7504 = vmatmul.mubr.f32.gmra.mrb[38].mxu1 %v10908_v33  ;;  %7026 = vmatprep.mubr.f32.mxu0 %v10909_v0  ;;  %v10928_v33 = vld [vmem:[#allocation39_spill] sm:$0xff] }
 0x11e   :  { %7506 = vmatprep.mubr.f32.mxu1 %v10909_v0  ;;  %v10929_v0 = vld [vmem:[#allocation40_spill] sm:$0xff] }
 0x120   :  { %7027 = vmatmul.mubr.f32.gmra.mrb[40].mxu0 %v9301_v53 }
 0x121   :  { %7507 = vmatmul.mubr.f32.gmra.mrb[40].mxu1 %v9301_v53  ;;  %7029 = vmatprep.mubr.f32.mxu0 %v9337_v50  ;;  %v10910_v53 = vld [vmem:[#allocation11_spill] sm:$0xff] }
 0x122   :  { %7509 = vmatprep.mubr.f32.mxu1 %v9337_v50  ;;  %v10911_v50 = vand.u32 4294901760, %v9329_v2  ;;  %v10917_v2 = vld [vmem:[#allocation17_spill] sm:$0xff] }
 0x124   :  { %7030 = vmatmul.mubr.f32.gmra.mrb[42].mxu0 %v9361_v17 }
 0x125   :  { %7510 = vmatmul.mubr.f32.gmra.mrb[42].mxu1 %v9361_v17  ;;  %7032 = vmatprep.mubr.f32.mxu0 %v9377_v21 }
 0x126   :  { %7512 = vmatprep.mubr.f32.mxu1 %v9377_v21  ;;  %v10912_v21 = vand.u32 4294901760, %v9334_v40  ;;  %v10918_v40 = vld [vmem:[#allocation19_spill] sm:$0xff] }
 0x128   :  { %7033 = vmatmul.mubr.f32.gmra.mrb[44].mxu0 %v9394_v7  ;;  %v7864_v17 = vpack.c.bf16 %v10912_v21, %v10911_v50  ;;  %v10931_v50 = vld [vmem:[#allocation45_spill] sm:$0xff]  ;;  %v10932_v21 = vld [vmem:[#allocation48_spill] sm:$0xff] }
 0x129   :  { %7513 = vmatmul.mubr.f32.gmra.mrb[44].mxu1 %v9394_v7  ;;  %7035 = vmatprep.mubr.f32.mxu0 %v9404_v56  ;;  %v10914_v7 = vand.u32 4294901760, %v9355_v23  ;;  %v10921_v23 = vld [vmem:[#allocation24_spill] sm:$0xff] }
 0x12a   :  { %7515 = vmatprep.mubr.f32.mxu1 %v9404_v56  ;;  %v10916_v56 = vld [vmem:[#allocation16_spill] sm:$0xff] }
 0x12b   :  { %v7912_v29 = vpack.c.bf16 %v10914_v7, %v10913_v13  ;;  %v10934_v13 = vld [vmem:[#allocation56_spill] sm:$0xff] }
 0x12c   :  { %7036 = vmatmul.mubr.f32.gmra.mrb[46].mxu0 %v9416_v36  ;;  %v10935_v7 = vld [vmem:[#allocation60_spill] sm:$0xff] }
 0x12d   :  { %7516 = vmatmul.mubr.f32.gmra.mrb[46].mxu1 %v9416_v36  ;;  %7046 = vmatprep.mubr.f32.mxu0 %v10910_v53  ;;  %v10922_v36 = vld [vmem:[#allocation26_spill] sm:$0xff] }
 0x12e   :  { %7526 = vmatprep.mubr.f32.mxu1 %v10910_v53  ;;  %v10930_v53 = vld [vmem:[#allocation43_spill] sm:$0xff] }
 0x130   :  { %7047 = vmatmul.mubr.f32.vlgmr.msra.gmra.mrb[0].mxu0 %v10915_v11 }
 0x131   :  { %7527 = vmatmul.mubr.f32.vlgmr.msra.gmra.mrb[0].mxu1 %v10915_v11  ;;  %7049 = vmatprep.mubr.f32.mxu0 %v10916_v56  ;;  %v10937_v11 = vld [vmem:[#allocation62_spill] sm:$0xff] }
 0x132   :  { %7529 = vmatprep.mubr.f32.mxu1 %v10916_v56  ;;  %7911 = vmatpush3.bf16.msra.mxu1 %v9578_v19  ;;  %v10920_v19 = vld [vmem:[#allocation22_spill] sm:$0xff]  ;;  %v10938_v56 = vld [vmem:[#allocation65_spill] sm:$0xff] }
 0x133   :  { %7863 = vmatpush3.bf16.msra.mxu0 %v7860_v43  ;;  %7913 = vmatprep.subr.bf16.mxu1 %v7912_v29  ;;  %v10923_v43 = vld [vmem:[#allocation30_spill] sm:$0xff] }
 0x134   :  { %7865 = vmatprep.subr.bf16.mxu0 %v7864_v17  ;;  %7050 = vmatmul.mubr.f32.gmra.mrb[2].mxu0 %v10917_v2 }
 0x135   :  { %7530 = vmatmul.mubr.f32.gmra.mrb[2].mxu1 %v10917_v2  ;;  %7052 = vmatprep.mubr.f32.mxu0 %v10918_v40  ;;  %v10939_v2 = vld [vmem:[#allocation68_spill] sm:$0xff] }
 0x136   :  { %7532 = vmatprep.mubr.f32.mxu1 %v10918_v40  ;;  %7915 = vmatpush3.bf16.msra.mxu1 %v7912_v29  ;;  %v10936_v29 = vld [vmem:[#allocation61_spill] sm:$0xff]  ;;  %v10940_v40 = vld [vmem:[#allocation71_spill] sm:$0xff] }
 0x137   :  { %7867 = vmatpush3.bf16.msra.mxu0 %v7864_v17  ;;  %7917 = vmatprep.subr.bf16.mxu1 %v8675_v22  ;;  %v10933_v17 = vld [vmem:[#allocation54_spill] sm:$0xff] }
 0x138   :  { %7869 = vmatprep.subr.bf16.mxu0 %v8657_v15  ;;  %7053 = vmatmul.mubr.f32.gmra.mrb[4].mxu0 %v10919_v6 }
 0x139   :  { %7533 = vmatmul.mubr.f32.gmra.mrb[4].mxu1 %v10919_v6  ;;  %7055 = vmatprep.mubr.f32.mxu0 %v10920_v19  ;;  %v10941_v6 = vld [vmem:[#allocation73_spill] sm:$0xff] }
 0x13a   :  { %7535 = vmatprep.mubr.f32.mxu1 %v10920_v19  ;;  %v10942_v19 = vld [vmem:[#allocation76_spill] sm:$0xff] }
 0x13c   :  { %7056 = vmatmul.mubr.f32.gmra.mrb[6].mxu0 %v10921_v23 }
 0x13d   :  { %7536 = vmatmul.mubr.f32.gmra.mrb[6].mxu1 %v10921_v23  ;;  %7058 = vmatprep.mubr.f32.mxu0 %v10922_v36  ;;  %v10943_v23 = vld [vmem:[#allocation79_spill] sm:$0xff] }
 0x13e   :  { %7538 = vmatprep.mubr.f32.mxu1 %v10922_v36  ;;  %v10944_v36 = vld [vmem:[#allocation87_spill] sm:$0xff] }
 0x140   :  { %7059 = vmatmul.mubr.f32.gmra.mrb[8].mxu0 %v10923_v43 }
 0x141   :  { %7539 = vmatmul.mubr.f32.gmra.mrb[8].mxu1 %v10923_v43  ;;  %7061 = vmatprep.mubr.f32.mxu0 %v10924_v32  ;;  %v10945_v43 = vld [vmem:[#allocation93_spill] sm:$0xff] }
 0x142   :  { %7541 = vmatprep.mubr.f32.mxu1 %v10924_v32  ;;  %v10946_v32 = vld [vmem:[#allocation94_spill] sm:$0xff] }
 0x144   :  { %7062 = vmatmul.mubr.f32.gmra.mrb[10].mxu0 %v10925_v26 }
 0x145   :  { %7542 = vmatmul.mubr.f32.gmra.mrb[10].mxu1 %v10925_v26  ;;  %7064 = vmatprep.mubr.f32.mxu0 %v10926_v47  ;;  %v10947_v26 = vld [vmem:[#allocation100_spill] sm:$0xff] }
 0x146   :  { %7544 = vmatprep.mubr.f32.mxu1 %v10926_v47  ;;  %v10948_v47 = vld [vmem:[#allocation101_spill] sm:$0xff] }
 0x148   :  { %7065 = vmatmul.mubr.f32.gmra.mrb[12].mxu0 %v10927_v62 }
 0x149   :  { %7545 = vmatmul.mubr.f32.gmra.mrb[12].mxu1 %v10927_v62  ;;  %7067 = vmatprep.mubr.f32.mxu0 %v10928_v33  ;;  %v10949_v62 = vld [vmem:[#allocation102_spill] sm:$0xff] }
 0x14a   :  { %7547 = vmatprep.mubr.f32.mxu1 %v10928_v33  ;;  %v10950_v33 = vld [vmem:[#allocation103_spill] sm:$0xff] }
 0x14c   :  { %7068 = vmatmul.mubr.f32.gmra.mrb[14].mxu0 %v10929_v0 }
 0x14d   :  { %7548 = vmatmul.mubr.f32.gmra.mrb[14].mxu1 %v10929_v0  ;;  %7070 = vmatprep.mubr.f32.mxu0 %v10930_v53  ;;  %v10951_v0 = vld [vmem:[#allocation104_spill] sm:$0xff] }
 0x14e   :  { %7550 = vmatprep.mubr.f32.mxu1 %v10930_v53  ;;  %v10952_v53 = vld [vmem:[#allocation105_spill] sm:$0xff] }
 0x150   :  { %7071 = vmatmul.mubr.f32.gmra.mrb[16].mxu0 %v10931_v50 }
 0x151   :  { %7551 = vmatmul.mubr.f32.gmra.mrb[16].mxu1 %v10931_v50  ;;  %7073 = vmatprep.mubr.f32.mxu0 %v10932_v21  ;;  %v10953_v50 = vld [vmem:[#allocation109_spill] sm:$0xff] }
 0x152   :  { %7553 = vmatprep.mubr.f32.mxu1 %v10932_v21  ;;  %v10954_v21 = vld [vmem:[#allocation110_spill] sm:$0xff] }
 0x154   :  { %7074 = vmatmul.mubr.f32.gmra.mrb[18].mxu0 %v10933_v17 }
 0x155   :  { %7554 = vmatmul.mubr.f32.gmra.mrb[18].mxu1 %v10933_v17  ;;  %7076 = vmatprep.mubr.f32.mxu0 %v10934_v13  ;;  %v10966_v17 = vld [vmem:[#allocation111_spill] sm:$0xff] }
 0x156   :  { %7556 = vmatprep.mubr.f32.mxu1 %v10934_v13  ;;  %v10967_v13 = vld [vmem:[#allocation112_spill] sm:$0xff] }
 0x158   :  { %7077 = vmatmul.mubr.f32.gmra.mrb[20].mxu0 %v10935_v7 }
 0x159   :  { %7557 = vmatmul.mubr.f32.gmra.mrb[20].mxu1 %v10935_v7  ;;  %7079 = vmatprep.mubr.f32.mxu0 %v10936_v29  ;;  %v10968_v7 = vld [vmem:[#allocation113_spill] sm:$0xff] }
 0x15a   :  { %7559 = vmatprep.mubr.f32.mxu1 %v10936_v29  ;;  %v10969_v29 = vld [vmem:[#allocation114_spill] sm:$0xff] }
 0x15c   :  { %7080 = vmatmul.mubr.f32.gmra.mrb[22].mxu0 %v10937_v11 }
 0x15d   :  { %7560 = vmatmul.mubr.f32.gmra.mrb[22].mxu1 %v10937_v11  ;;  %7082 = vmatprep.mubr.f32.mxu0 %v10938_v56  ;;  %v10970_v11 = vld [vmem:[#allocation115_spill] sm:$0xff] }
 0x15e   :  { %7562 = vmatprep.mubr.f32.mxu1 %v10938_v56  ;;  %v10971_v56 = vld [vmem:[#allocation116_spill] sm:$0xff] }
 0x160   :  { %7083 = vmatmul.mubr.f32.gmra.mrb[24].mxu0 %v10939_v2 }
 0x161   :  { %7563 = vmatmul.mubr.f32.gmra.mrb[24].mxu1 %v10939_v2  ;;  %7085 = vmatprep.mubr.f32.mxu0 %v10940_v40 }
 0x162   :  { %7565 = vmatprep.mubr.f32.mxu1 %v10940_v40  ;;  %v10972_v40 = vmov 0 }
 0x164   :  { %7086 = vmatmul.mubr.f32.gmra.mrb[26].mxu0 %v10941_v6 }
 0x165   :  { %7566 = vmatmul.mubr.f32.gmra.mrb[26].mxu1 %v10941_v6  ;;  %7088 = vmatprep.mubr.f32.mxu0 %v10942_v19 }
 0x166   :  { %7568 = vmatprep.mubr.f32.mxu1 %v10942_v19 }
 0x168   :  { %7089 = vmatmul.mubr.f32.gmra.mrb[28].mxu0 %v10943_v23 }
 0x169   :  { %7569 = vmatmul.mubr.f32.gmra.mrb[28].mxu1 %v10943_v23  ;;  %7091 = vmatprep.mubr.f32.mxu0 %v10944_v36 }
 0x16a   :  { %7571 = vmatprep.mubr.f32.mxu1 %v10944_v36 }
 0x16c   :  { %7092 = vmatmul.mubr.f32.gmra.mrb[30].mxu0 %v10945_v43 }
 0x16d   :  { %7572 = vmatmul.mubr.f32.gmra.mrb[30].mxu1 %v10945_v43  ;;  %7094 = vmatprep.mubr.f32.mxu0 %v10946_v32 }
 0x16e   :  { %7574 = vmatprep.mubr.f32.mxu1 %v10946_v32 }
 0x170   :  { %7095 = vmatmul.mubr.f32.gmra.mrb[32].mxu0 %v10947_v26 }
 0x171   :  { %7575 = vmatmul.mubr.f32.gmra.mrb[32].mxu1 %v10947_v26  ;;  %7097 = vmatprep.mubr.f32.mxu0 %v10948_v47 }
 0x172   :  { %7577 = vmatprep.mubr.f32.mxu1 %v10948_v47 }
 0x174   :  { %7098 = vmatmul.mubr.f32.gmra.mrb[34].mxu0 %v10949_v62 }
 0x175   :  { %7578 = vmatmul.mubr.f32.gmra.mrb[34].mxu1 %v10949_v62  ;;  %7100 = vmatprep.mubr.f32.mxu0 %v10950_v33  ;;  %v10976_v62 = vmov 0 }
 0x176   :  { %7580 = vmatprep.mubr.f32.mxu1 %v10950_v33 }
 0x178   :  { %7101 = vmatmul.mubr.f32.gmra.mrb[36].mxu0 %v10951_v0 }
 0x179   :  { %7581 = vmatmul.mubr.f32.gmra.mrb[36].mxu1 %v10951_v0  ;;  %7103 = vmatprep.mubr.f32.mxu0 %v10952_v53 }
 0x17a   :  { %7583 = vmatprep.mubr.f32.mxu1 %v10952_v53 }
 0x17c   :  { %7104 = vmatmul.mubr.f32.gmra.mrb[38].mxu0 %v10953_v50 }
 0x17d   :  { %7584 = vmatmul.mubr.f32.gmra.mrb[38].mxu1 %v10953_v50  ;;  %7106 = vmatprep.mubr.f32.mxu0 %v10954_v21 }
 0x17e   :  { %7586 = vmatprep.mubr.f32.mxu1 %v10954_v21 }
 0x180   :  { %7107 = vmatmul.mubr.f32.gmra.mrb[40].mxu0 %v9358_v25 }
 0x181   :  { %7587 = vmatmul.mubr.f32.gmra.mrb[40].mxu1 %v9358_v25  ;;  %7109 = vmatprep.mubr.f32.mxu0 %v9374_v10  ;;  %v10957_v25 = vld [vmem:[#allocation81_spill] sm:$0xff] }
 0x182   :  { %7589 = vmatprep.mubr.f32.mxu1 %v9374_v10  ;;  %v10959_v10 = vld [vmem:[#allocation85_spill] sm:$0xff] }
 0x184   :  { %7110 = vmatmul.mubr.f32.gmra.mrb[42].mxu0 %v9391_v61 }
 0x185   :  { %7590 = vmatmul.mubr.f32.gmra.mrb[42].mxu1 %v9391_v61  ;;  %7112 = vmatprep.mubr.f32.mxu0 %v9401_v60  ;;  %v10961_v61 = vld [vmem:[#allocation88_spill] sm:$0xff] }
 0x186   :  { %7592 = vmatprep.mubr.f32.mxu1 %v9401_v60  ;;  %v10962_v60 = vld [vmem:[#allocation90_spill] sm:$0xff] }
 0x188   :  { %7113 = vmatmul.mubr.f32.gmra.mrb[44].mxu0 %v9413_v8 }
 0x189   :  { %7593 = vmatmul.mubr.f32.gmra.mrb[44].mxu1 %v9413_v8  ;;  %7115 = vmatprep.mubr.f32.mxu0 %v9421_v4  ;;  %v10963_v8 = vld [vmem:[#allocation98_spill] sm:$0xff] }
 0x18a   :  { %7595 = vmatprep.mubr.f32.mxu1 %v9421_v4  ;;  %v10964_v4 = vld [vmem:[#allocation99_spill] sm:$0xff] }
 0x18c   :  { %7116 = vmatmul.mubr.f32.gmra.mrb[46].mxu0 %v9426_v1 }
 0x18d   :  { %7596 = vmatmul.mubr.f32.gmra.mrb[46].mxu1 %v9426_v1  ;;  %7126 = vmatprep.mubr.f32.mxu0 %v8683_v24  ;;  %v10965_v1 = vld [vmem:[#allocation108_spill] sm:$0xff] }
 0x18e   :  { %7606 = vmatprep.mubr.f32.mxu1 %v8683_v24 }
 0x190   :  { %7127 = vmatmul.mubr.f32.vlgmr.msra.gmra.mrb[0].mxu0 %v8702_v30 }
 0x191   :  { %7607 = vmatmul.mubr.f32.vlgmr.msra.gmra.mrb[0].mxu1 %v8702_v30  ;;  %7129 = vmatprep.mubr.f32.mxu0 %v8711_v34 }
 0x192   :  { %7609 = vmatprep.mubr.f32.mxu1 %v8711_v34  ;;  %7919 = vmatpush3.bf16.msra.mxu1 %v8675_v22  ;;  %v10956_v22 = vld [vmem:[#allocation78_spill] sm:$0xff] }
 0x193   :  { %7871 = vmatpush3.bf16.msra.mxu0 %v8657_v15  ;;  %7921 = vmatprep.subr.bf16.mxu1 %v10867_v3  ;;  %v10955_v15 = vld [vmem:[#allocation77_spill] sm:$0xff] }
 0x194   :  { %7873 = vmatprep.subr.bf16.mxu0 %v10866_v58  ;;  %7130 = vmatmul.mubr.f32.gmra.mrb[2].mxu0 %v8713_v35 }
 0x195   :  { %7610 = vmatmul.mubr.f32.gmra.mrb[2].mxu1 %v8713_v35  ;;  %7132 = vmatprep.mubr.f32.mxu0 %v8724_v39 }
 0x196   :  { %7612 = vmatprep.mubr.f32.mxu1 %v8724_v39  ;;  %7923 = vmatpush3.bf16.msra.mxu1 %v10867_v3  ;;  %v10958_v3 = vld [vmem:[#allocation84_spill] sm:$0xff] }
 0x197   :  { %7875 = vmatpush3.bf16.msra.mxu0 %v10866_v58  ;;  %v10960_v58 = vld [vmem:[#allocation86_spill] sm:$0xff] }
 0x198   :  { %7133 = vmatmul.mubr.f32.gmra.mrb[4].mxu0 %v8738_v45 }
 0x199   :  { %7613 = vmatmul.mubr.f32.gmra.mrb[4].mxu1 %v8738_v45  ;;  %7135 = vmatprep.mubr.f32.mxu0 %v8746_v48 }
 0x19a   :  { %7615 = vmatprep.mubr.f32.mxu1 %v8746_v48 }
 0x19c   :  { %7136 = vmatmul.mubr.f32.gmra.mrb[6].mxu0 %v8770_v57 }
 0x19d   :  { %7616 = vmatmul.mubr.f32.gmra.mrb[6].mxu1 %v8770_v57  ;;  %7138 = vmatprep.mubr.f32.mxu0 %v8807_v37 }
 0x19e   :  { %7618 = vmatprep.mubr.f32.mxu1 %v8807_v37 }
 0x1a0   :  { %7139 = vmatmul.mubr.f32.gmra.mrb[8].mxu0 %v8821_v63 }
 0x1a1   :  { %7619 = vmatmul.mubr.f32.gmra.mrb[8].mxu1 %v8821_v63  ;;  %7141 = vmatprep.mubr.f32.mxu0 %v8826_v16 }
 0x1a2   :  { %7621 = vmatprep.mubr.f32.mxu1 %v8826_v16 }
 0x1a4   :  { %7142 = vmatmul.mubr.f32.gmra.mrb[10].mxu0 %v8828_v14 }
 0x1a5   :  { %7622 = vmatmul.mubr.f32.gmra.mrb[10].mxu1 %v8828_v14  ;;  %7144 = vmatprep.mubr.f32.mxu0 %v8840_v28 }
 0x1a6   :  { %7624 = vmatprep.mubr.f32.mxu1 %v8840_v28 }
 0x1a8   :  { %7145 = vmatmul.mubr.f32.gmra.mrb[12].mxu0 %v8851_v41 }
 0x1a9   :  { %7625 = vmatmul.mubr.f32.gmra.mrb[12].mxu1 %v8851_v41  ;;  %7147 = vmatprep.mubr.f32.mxu0 %v8862_v49 }
 0x1aa   :  { %7627 = vmatprep.mubr.f32.mxu1 %v8862_v49 }
 0x1ac   :  { %7148 = vmatmul.mubr.f32.gmra.mrb[14].mxu0 %v8887_v18 }
 0x1ad   :  { %7628 = vmatmul.mubr.f32.gmra.mrb[14].mxu1 %v8887_v18  ;;  %7150 = vmatprep.mubr.f32.mxu0 %v8909_v55 }
 0x1ae   :  { %7630 = vmatprep.mubr.f32.mxu1 %v8909_v55 }
 0x1b0   :  { %7151 = vmatmul.mubr.f32.gmra.mrb[16].mxu0 %v8918_v46 }
 0x1b1   :  { %7631 = vmatmul.mubr.f32.gmra.mrb[16].mxu1 %v8918_v46  ;;  %7153 = vmatprep.mubr.f32.mxu0 %v8930_v42 }
 0x1b2   :  { %7633 = vmatprep.mubr.f32.mxu1 %v8930_v42 }
 0x1b4   :  { %7154 = vmatmul.mubr.f32.gmra.mrb[18].mxu0 %v8942_v27 }
 0x1b5   :  { %7634 = vmatmul.mubr.f32.gmra.mrb[18].mxu1 %v8942_v27  ;;  %7156 = vmatprep.mubr.f32.mxu0 %v8953_v9 }
 0x1b6   :  { %7636 = vmatprep.mubr.f32.mxu1 %v8953_v9 }
 0x1b8   :  { %7157 = vmatmul.mubr.f32.gmra.mrb[20].mxu0 %v8964_v51 }
 0x1b9   :  { %7637 = vmatmul.mubr.f32.gmra.mrb[20].mxu1 %v8964_v51  ;;  %7159 = vmatprep.mubr.f32.mxu0 %v10841_v5 }
 0x1ba   :  { %7639 = vmatprep.mubr.f32.mxu1 %v10841_v5 }
 0x1bc   :  { %7160 = vmatmul.mubr.f32.gmra.mrb[22].mxu0 %v10842_v31 }
 0x1bd   :  { %7640 = vmatmul.mubr.f32.gmra.mrb[22].mxu1 %v10842_v31  ;;  %7162 = vmatprep.mubr.f32.mxu0 %v10843_v44 }
 0x1be   :  { %7642 = vmatprep.mubr.f32.mxu1 %v10843_v44 }
 0x1c0   :  { %7163 = vmatmul.mubr.f32.gmra.mrb[24].mxu0 %v10844_v20 }
 0x1c1   :  { %7643 = vmatmul.mubr.f32.gmra.mrb[24].mxu1 %v10844_v20  ;;  %7165 = vmatprep.mubr.f32.mxu0 %v10845_v12 }
 0x1c2   :  { %7645 = vmatprep.mubr.f32.mxu1 %v10845_v12 }
 0x1c4   :  { %7166 = vmatmul.mubr.f32.gmra.mrb[26].mxu0 %v10846_v52 }
 0x1c5   :  { %7646 = vmatmul.mubr.f32.gmra.mrb[26].mxu1 %v10846_v52  ;;  %7168 = vmatprep.mubr.f32.mxu0 %v10847_v54 }
 0x1c6   :  { %7648 = vmatprep.mubr.f32.mxu1 %v10847_v54 }
 0x1c8   :  { %7169 = vmatmul.mubr.f32.gmra.mrb[28].mxu0 %v10848_v38 }
 0x1c9   :  { %7649 = vmatmul.mubr.f32.gmra.mrb[28].mxu1 %v10848_v38  ;;  %7171 = vmatprep.mubr.f32.mxu0 %v10849_v59 }
 0x1ca   :  { %7651 = vmatprep.mubr.f32.mxu1 %v10849_v59 }
 0x1cc   :  { %7172 = vmatmul.mubr.f32.gmra.mrb[30].mxu0 %v10955_v15 }
 0x1cd   :  { %7652 = vmatmul.mubr.f32.gmra.mrb[30].mxu1 %v10955_v15  ;;  %7174 = vmatprep.mubr.f32.mxu0 %v10956_v22 }
 0x1ce   :  { %7654 = vmatprep.mubr.f32.mxu1 %v10956_v22 }
 0x1d0   :  { %7175 = vmatmul.mubr.f32.gmra.mrb[32].mxu0 %v10957_v25 }
 0x1d1   :  { %7655 = vmatmul.mubr.f32.gmra.mrb[32].mxu1 %v10957_v25  ;;  %7177 = vmatprep.mubr.f32.mxu0 %v10958_v3 }
 0x1d2   :  { %7657 = vmatprep.mubr.f32.mxu1 %v10958_v3 }
 0x1d4   :  { %7178 = vmatmul.mubr.f32.gmra.mrb[34].mxu0 %v10959_v10 }
 0x1d5   :  { %7658 = vmatmul.mubr.f32.gmra.mrb[34].mxu1 %v10959_v10  ;;  %7180 = vmatprep.mubr.f32.mxu0 %v10960_v58 }
 0x1d6   :  { %7660 = vmatprep.mubr.f32.mxu1 %v10960_v58 }
 0x1d8   :  { %7181 = vmatmul.mubr.f32.gmra.mrb[36].mxu0 %v10961_v61 }
 0x1d9   :  { %7661 = vmatmul.mubr.f32.gmra.mrb[36].mxu1 %v10961_v61  ;;  %7183 = vmatprep.mubr.f32.mxu0 %v10962_v60 }
 0x1da   :  { %7663 = vmatprep.mubr.f32.mxu1 %v10962_v60 }
 0x1dc   :  { %7184 = vmatmul.mubr.f32.gmra.mrb[38].mxu0 %v10963_v8 }
 0x1dd   :  { %7664 = vmatmul.mubr.f32.gmra.mrb[38].mxu1 %v10963_v8  ;;  %7186 = vmatprep.mubr.f32.mxu0 %v10964_v4 }
 0x1de   :  { %7666 = vmatprep.mubr.f32.mxu1 %v10964_v4 }
 0x1e0   :  { %7187 = vmatmul.mubr.f32.gmra.mrb[40].mxu0 %v10965_v1 }
 0x1e1   :  { %7667 = vmatmul.mubr.f32.gmra.mrb[40].mxu1 %v10965_v1  ;;  %7189 = vmatprep.mubr.f32.mxu0 %v10966_v17 }
 0x1e2   :  { %7669 = vmatprep.mubr.f32.mxu1 %v10966_v17 }
 0x1e4   :  { %7190 = vmatmul.mubr.f32.gmra.mrb[42].mxu0 %v10967_v13 }
 0x1e5   :  { %7670 = vmatmul.mubr.f32.gmra.mrb[42].mxu1 %v10967_v13  ;;  %7192 = vmatprep.mubr.f32.mxu0 %v10968_v7 }
 0x1e6   :  { %7672 = vmatprep.mubr.f32.mxu1 %v10968_v7 }
 0x1e8   :  { %7193 = vmatmul.mubr.f32.gmra.mrb[44].mxu0 %v10969_v29 }
 0x1e9   :  { %7673 = vmatmul.mubr.f32.gmra.mrb[44].mxu1 %v10969_v29  ;;  %7195 = vmatprep.mubr.f32.mxu0 %v10970_v11 }
 0x1ea   :  { %7675 = vmatprep.mubr.f32.mxu1 %v10970_v11 }
 0x1ec   :  { %7196 = vmatmul.mubr.f32.gmra.mrb[46].mxu0 %v10971_v56 }
 0x1ed   :  { %7676 = vmatmul.mubr.f32.gmra.mrb[46].mxu1 %v10971_v56  ;;  %7206 = vmatprep.mubr.f32.mxu0 %v8683_v24 }
 0x1ee   :  { %7686 = vmatprep.mubr.f32.mxu1 %v8683_v24  ;;  %v5551_v24 = vlaneseq }
 0x1f0   :  { %7207 = vmatmul.mubr.f32.vlgmr.msra.gmra.mrb[0].mxu0 %v8702_v30 }
 0x1f1   :  { %7687 = vmatmul.mubr.f32.vlgmr.msra.gmra.mrb[0].mxu1 %v8702_v30  ;;  %7209 = vmatprep.mubr.f32.mxu0 %v8711_v34  ;;  %v5573_v30 = vshrl.u32 %v5551_v24, 7 }
 0x1f2   :  { %7689 = vmatprep.mubr.f32.mxu1 %v8711_v34  ;;  %v5552_v34 = vand.u32 127, %v5551_v24 }
 0x1f4   :  { %7210 = vmatmul.mubr.f32.gmra.mrb[2].mxu0 %v8713_v35 }
 0x1f5   :  { %7690 = vmatmul.mubr.f32.gmra.mrb[2].mxu1 %v8713_v35  ;;  %7212 = vmatprep.mubr.f32.mxu0 %v8724_v39  ;;  %v5578_v35 = vsub.s32 1, %v5573_v30 }
 0x1f6   :  { %7692 = vmatprep.mubr.f32.mxu1 %v8724_v39  ;;  %v5553_v39 = vadd.s32 128, %v5552_v34 }
 0x1f8   :  { %7213 = vmatmul.mubr.f32.gmra.mrb[4].mxu0 %v8738_v45 }
 0x1f9   :  { %7693 = vmatmul.mubr.f32.gmra.mrb[4].mxu1 %v8738_v45  ;;  %7215 = vmatprep.mubr.f32.mxu0 %v8746_v48  ;;  %v5574_v45 = vsub.s32 0, %v5573_v30 }
 0x1fa   :  { %7695 = vmatprep.mubr.f32.mxu1 %v8746_v48 }
 0x1fc   :  { %7216 = vmatmul.mubr.f32.gmra.mrb[6].mxu0 %v8770_v57 }
 0x1fd   :  { %7696 = vmatmul.mubr.f32.gmra.mrb[6].mxu1 %v8770_v57  ;;  %7218 = vmatprep.mubr.f32.mxu0 %v8807_v37 }
 0x1fe   :  { %7698 = vmatprep.mubr.f32.mxu1 %v8807_v37 }
 0x200   :  { %7219 = vmatmul.mubr.f32.gmra.mrb[8].mxu0 %v8821_v63 }
 0x201   :  { %7699 = vmatmul.mubr.f32.gmra.mrb[8].mxu1 %v8821_v63  ;;  %7221 = vmatprep.mubr.f32.mxu0 %v8826_v16 }
 0x202   :  { %7701 = vmatprep.mubr.f32.mxu1 %v8826_v16  ;;  %v8569_v16 = vmov 0.0  }
 0x203   :  { %95 = vst [vmem:[#allocation4] sm:$0xf] %v8569_v16 }
 0x204   :  { %7222 = vmatmul.mubr.f32.gmra.mrb[10].mxu0 %v8828_v14 }
 0x205   :  { %7702 = vmatmul.mubr.f32.gmra.mrb[10].mxu1 %v8828_v14  ;;  %7224 = vmatprep.mubr.f32.mxu0 %v8840_v28  ;;  %v8570_v14 = vmov 0.0|0.0  }
 0x206   :  { %7704 = vmatprep.mubr.f32.mxu1 %v8840_v28  ;;  %7956 = vmatprep.subr.bf16.mxu1 %v8570_v14 }
 0x208   :  { %7225 = vmatmul.mubr.f32.gmra.mrb[12].mxu0 %v8851_v41 }
 0x209   :  { %7705 = vmatmul.mubr.f32.gmra.mrb[12].mxu1 %v8851_v41  ;;  %7227 = vmatprep.mubr.f32.mxu0 %v8862_v49 }
 0x20a   :  { %7707 = vmatprep.mubr.f32.mxu1 %v8862_v49  ;;  %v5554_v49 = vadd.s32 256, %v5552_v34 }
 0x20c   :  { %7228 = vmatmul.mubr.f32.gmra.mrb[14].mxu0 %v8887_v18 }
 0x20d   :  { %7708 = vmatmul.mubr.f32.gmra.mrb[14].mxu1 %v8887_v18  ;;  %7230 = vmatprep.mubr.f32.mxu0 %v8909_v55 }
 0x20e   :  { %7710 = vmatprep.mubr.f32.mxu1 %v8909_v55 }
 0x210   :  { %7231 = vmatmul.mubr.f32.gmra.mrb[16].mxu0 %v8918_v46 }
 0x211   :  { %7711 = vmatmul.mubr.f32.gmra.mrb[16].mxu1 %v8918_v46  ;;  %7233 = vmatprep.mubr.f32.mxu0 %v8930_v42  ;;  %v5560_v46 = vstv %s10466_s0  ;;  %s8573_s0 = smov [#allocation4]  }
 0x212   :  { %7713 = vmatprep.mubr.f32.mxu1 %v8930_v42  ;;  %v5570_v42 = vld [vmem:[%s10470_s4] sm:$0x7]  ;;  %vm5562_vm1 = vcmp.lt.s32.totalorder %v5553_v39, %v5560_v46  ;;  %vm5561_vm2 = vcmp.lt.s32.totalorder %v5552_v34, %v5560_v46  ;;  %vm5563_vm5 = vcmp.lt.s32.totalorder %v5554_v49, %v5560_v46  ;;  %v10988_v39 = vmov 0  ;;  %s5900_s4 = sshll.u32 %s8573_s0, 4  ;;  %s5901_s4 = int_to_ptr.vmem [resolvable:$true] %s5900_s4 }
 0x213   :  { %v5579_v48 = vrot.slane %v5570_v42, %v5578_v35  ;;  %v5966_v37 = vsel %vm5562_vm1, 1.0, %v8569_v16  ;;  %s8545_s25 = scalar_lea.vmem %s5901_s4, 64  ;;  %p8550_p1 = scmp.lt.s32.totalorder %s5901_s4, %s5901_s4 }
 0x214   :  { %7234 = vmatmul.mubr.f32.gmra.mrb[18].mxu0 %v8942_v27  ;;  %p8546_p0 = scmp.ne.s32.totalorder %s5901_s4, %s8545_s25  ;;  %p8551_p2 = scmp.lt.s32.totalorder %s8545_s25, %s8545_s25 }
 0x215   :  { %7714 = vmatmul.mubr.f32.gmra.mrb[18].mxu1 %v8942_v27  ;;  %7236 = vmatprep.mubr.f32.mxu0 %v8953_v9  ;;  %v5588_v55 = vsel %vm5562_vm1, %v5579_v48, 0.0  ;;  %v5965_v27 = vsel %vm5561_vm2, 1.0, %v8569_v16 }
 0x216   :  { %7716 = vmatprep.mubr.f32.mxu1 %v8953_v9  ;;  %v5594_v18 = vrot.slane %v5588_v55, 7  ;;  %v5582_v9 = vsub.s32 2, %v5573_v30  ;;  %p8552_p3 = por %p8551_p2, %p8550_p1 }
 0x218   :  { %7237 = vmatmul.mubr.f32.gmra.mrb[20].mxu0 %v8964_v51  ;;  %v9962_v28 = vsel %vm5599_vm3, %v5966_v37, %v5594_v18  ;;  %v10992_v37 = vmov 0  ;;  %p8553_p4 = pnand %p8552_p3, %p8546_p0 }
 0x219   :  { %7717 = vmatmul.mubr.f32.gmra.mrb[20].mxu1 %v8964_v51  ;;  %7239 = vmatprep.mubr.f32.mxu0 %v10841_v5  ;;  %v5575_v51 = vrot.slane %v5570_v42, %v5574_v45 }
 0x21a   :  { %7719 = vmatprep.mubr.f32.mxu1 %v10841_v5  ;;  %v5583_v5 = vrot.slane %v5570_v42, %v5582_v9 }
 0x21b   :  { %v5587_v57 = vsel %vm5561_vm2, %v5575_v51, 0.0 }
 0x21c   :  { %7240 = vmatmul.mubr.f32.gmra.mrb[22].mxu0 %v10842_v31  ;;  %v5593_v63 = vrot.slane %v5587_v57, 7 }
 0x21d   :  { %7720 = vmatmul.mubr.f32.gmra.mrb[22].mxu1 %v10842_v31  ;;  %7242 = vmatprep.mubr.f32.mxu0 %v10843_v44  ;;  %v5967_v31 = vsel %vm5563_vm5, 1.0, %v8569_v16 }
 0x21e   :  { %7722 = vmatprep.mubr.f32.mxu1 %v10843_v44  ;;  %v9964_v41 = vsel %vm5599_vm3, %v5965_v27, %v5593_v63  ;;  %v5589_v44 = vsel %vm5563_vm5, %v5583_v5, 0.0 }
 0x220   :  { %7243 = vmatmul.mubr.f32.gmra.mrb[24].mxu0 %v10844_v20 }
 0x221   :  { %7723 = vmatmul.mubr.f32.gmra.mrb[24].mxu1 %v10844_v20  ;;  %7245 = vmatprep.mubr.f32.mxu0 %v10845_v12  ;;  %v5595_v20 = vrot.slane %v5589_v44, 7 }
 0x222   :  { %7725 = vmatprep.mubr.f32.mxu1 %v10845_v12 }
 0x223   :  { %v9969_v12 = vsel %vm5599_vm3, %v5967_v31, %v5595_v20 }
 0x224   :  { %7246 = vmatmul.mubr.f32.gmra.mrb[26].mxu0 %v10846_v52 }
 0x225   :  { %7726 = vmatmul.mubr.f32.gmra.mrb[26].mxu1 %v10846_v52  ;;  %7248 = vmatprep.mubr.f32.mxu0 %v10847_v54 }
 0x226   :  { %7728 = vmatprep.mubr.f32.mxu1 %v10847_v54 }
 0x228   :  { %7249 = vmatmul.mubr.f32.gmra.mrb[28].mxu0 %v10848_v38 }
 0x229   :  { %7729 = vmatmul.mubr.f32.gmra.mrb[28].mxu1 %v10848_v38  ;;  %7251 = vmatprep.mubr.f32.mxu0 %v10849_v59 }
 0x22a   :  { %7731 = vmatprep.mubr.f32.mxu1 %v10849_v59 }
 0x22c   :  { %7252 = vmatmul.mubr.f32.gmra.mrb[30].mxu0 %v10955_v15 }
 0x22d   :  { %7732 = vmatmul.mubr.f32.gmra.mrb[30].mxu1 %v10955_v15  ;;  %7254 = vmatprep.mubr.f32.mxu0 %v10956_v22 }
 0x22e   :  { %7734 = vmatprep.mubr.f32.mxu1 %v10956_v22 }
 0x230   :  { %7255 = vmatmul.mubr.f32.gmra.mrb[32].mxu0 %v10957_v25 }
 0x231   :  { %7735 = vmatmul.mubr.f32.gmra.mrb[32].mxu1 %v10957_v25  ;;  %7257 = vmatprep.mubr.f32.mxu0 %v10958_v3 }
 0x232   :  { %7737 = vmatprep.mubr.f32.mxu1 %v10958_v3  ;;  %v10980_v3 = vmov 0 }
 0x234   :  { %7258 = vmatmul.mubr.f32.gmra.mrb[34].mxu0 %v10959_v10 }
 0x235   :  { %7738 = vmatmul.mubr.f32.gmra.mrb[34].mxu1 %v10959_v10  ;;  %7260 = vmatprep.mubr.f32.mxu0 %v10960_v58 }
 0x236   :  { %7740 = vmatprep.mubr.f32.mxu1 %v10960_v58 }
 0x238   :  { %7261 = vmatmul.mubr.f32.gmra.mrb[36].mxu0 %v10961_v61 }
 0x239   :  { %7741 = vmatmul.mubr.f32.gmra.mrb[36].mxu1 %v10961_v61  ;;  %7263 = vmatprep.mubr.f32.mxu0 %v10962_v60 }
 0x23a   :  { %7743 = vmatprep.mubr.f32.mxu1 %v10962_v60 }
 0x23c   :  { %7264 = vmatmul.mubr.f32.gmra.mrb[38].mxu0 %v10963_v8 }
 0x23d   :  { %7744 = vmatmul.mubr.f32.gmra.mrb[38].mxu1 %v10963_v8  ;;  %7266 = vmatprep.mubr.f32.mxu0 %v10964_v4 }
 0x23e   :  { %7746 = vmatprep.mubr.f32.mxu1 %v10964_v4 }
 0x240   :  { %7267 = vmatmul.mubr.f32.gmra.mrb[40].mxu0 %v10965_v1 }
 0x241   :  { %7747 = vmatmul.mubr.f32.gmra.mrb[40].mxu1 %v10965_v1  ;;  %7269 = vmatprep.mubr.f32.mxu0 %v10966_v17 }
 0x242   :  { %7749 = vmatprep.mubr.f32.mxu1 %v10966_v17 }
 0x244   :  { %7270 = vmatmul.mubr.f32.gmra.mrb[42].mxu0 %v10967_v13 }
 0x245   :  { %7750 = vmatmul.mubr.f32.gmra.mrb[42].mxu1 %v10967_v13  ;;  %7272 = vmatprep.mubr.f32.mxu0 %v10968_v7  ;;  %v10984_v13 = vmov 0 }
 0x246   :  { %7752 = vmatprep.mubr.f32.mxu1 %v10968_v7 }
 0x248   :  { %7273 = vmatmul.mubr.f32.gmra.mrb[44].mxu0 %v10969_v29 }
 0x249   :  { %7753 = vmatmul.mubr.f32.gmra.mrb[44].mxu1 %v10969_v29  ;;  %7275 = vmatprep.mubr.f32.mxu0 %v10970_v11 }
 0x24a   :  { %7755 = vmatprep.mubr.f32.mxu1 %v10970_v11 }
 0x24c   :  { %7276 = vmatmul.mubr.f32.gmra.mrb[46].mxu0 %v10971_v56 }
 0x24d   :  { %7756 = vmatmul.mubr.f32.gmra.mrb[46].mxu1 %v10971_v56  ;;  %6000 = vmatprep.mubr.msk.f32.mxu0 %vm10719_vm4, %v9962_v28 }
 0x24e   :  { %7790 = vmatprep.mubr.msk.f32.mxu1 %vm10718_vm6, %v8569_v16 }
 0x2c3   :  { %v7208_v52 = vpop.f32.mrb[0].mxu0 }
 0x2c4   :  { %v7688_v54 = vpop.f32.mrb[0].mxu1  ;;  %vm5454_vm7 = vcmp.ge.f32.partialorder %v7208_v52, 0.0  ;;  %v2513_v38 = vpop.f32.mrb[1].mxu0  ;;  %v10996_v52 = vmov 0 }
 0x2c5   :  { %vm5310_vm8 = vcmp.ge.f32.partialorder %v7688_v54, 0.0  ;;  %v5023_v59 = vpop.f32.mrb[1].mxu1  ;;  %vm5453_vm9 = vcmp.ge.f32.partialorder %v2513_v38, 0.0 }
 0x2c6   :  { %v9974_v2 = vsel %vm5310_vm8, 1.0, %v8569_v16  ;;  %vm5309_vm10 = vcmp.ge.f32.partialorder %v5023_v59, 0.0  ;;  %vm9976_vm11 = vmpackc.low %vm5454_vm7, %vm5453_vm9 }
 0x2c7   :  { %v10973_v40 = vsel %vm9976_vm11, 4294967295, %v10972_v40  ;;  %v9981_v6 = vsel %vm5309_vm10, 1.0, %v8569_v16  ;;  %vm9983_vm12 = vmpackc.low %vm5310_vm8, %vm5309_vm10  ;;  %v7211_v36 = vpop.f32.mrb[2].mxu0 }
 0x2c8   :  { %v7983_v23 = vpack.c.bf16 %v9974_v2, %v9981_v6  ;;  %v7691_v43 = vpop.f32.mrb[2].mxu1  ;;  %vm5456_vm13 = vcmp.ge.f32.partialorder %v7211_v36, 0.0  ;;  %v2525_v32 = vpop.f32.mrb[3].mxu0 }
 0x2c9   :  { %vm5312_vm14 = vcmp.ge.f32.partialorder %v7691_v43, 0.0  ;;  %v5035_v26 = vpop.f32.mrb[3].mxu1  ;;  %vm5455_vm15 = vcmp.ge.f32.partialorder %v2525_v32, 0.0 }
 0x2ca   :  { %v9990_v47 = vsel %vm5312_vm14, 1.0, %v8569_v16  ;;  %vm5311_vm0 = vcmp.ge.f32.partialorder %v5035_v26, 0.0  ;;  %vm9992_vm1 = vmpackc.low %vm5456_vm13, %vm5455_vm15 }
 0x2cb   :  { %v10977_v62 = vsel %vm9992_vm1, 4294967295, %v10976_v62  ;;  %v9997_v33 = vsel %vm5311_vm0, 1.0, %v8569_v16  ;;  %vm9999_vm2 = vmpackc.low %vm5312_vm14, %vm5311_vm0  ;;  %v7214_v50 = vpop.f32.mrb[4].mxu0 }
 0x2cc   :  { %v7694_v21 = vpop.f32.mrb[4].mxu1  ;;  %vm5458_vm3 = vcmp.ge.f32.partialorder %v7214_v50, 0.0  ;;  %v2537_v15 = vpop.f32.mrb[5].mxu0 }
 0x2cd   :  { %vm5314_vm5 = vcmp.ge.f32.partialorder %v7694_v21, 0.0  ;;  %v5047_v22 = vpop.f32.mrb[5].mxu1  ;;  %vm5457_vm7 = vcmp.ge.f32.partialorder %v2537_v15, 0.0  ;;  %v11000_v21 = vmov 0 }
 0x2ce   :  { %v10006_v25 = vsel %vm5314_vm5, 1.0, %v8569_v16  ;;  %vm5313_vm8 = vcmp.ge.f32.partialorder %v5047_v22, 0.0  ;;  %vm10008_vm9 = vmpackc.low %vm5458_vm3, %vm5457_vm7 }
 0x2cf   :  { %v10981_v3 = vsel %vm10008_vm9, 4294967295, %v10980_v3  ;;  %v10013_v10 = vsel %vm5313_vm8, 1.0, %v8569_v16  ;;  %vm10015_vm10 = vmpackc.low %vm5314_vm5, %vm5313_vm8  ;;  %v7217_v60 = vpop.f32.mrb[6].mxu0 }
 0x2d0   :  { %v7697_v8 = vpop.f32.mrb[6].mxu1  ;;  %vm5460_vm13 = vcmp.ge.f32.partialorder %v7217_v60, 0.0  ;;  %v2549_v4 = vpop.f32.mrb[7].mxu0 }
 0x2d1   :  { %vm5316_vm14 = vcmp.ge.f32.partialorder %v7697_v8, 0.0  ;;  %v5059_v1 = vpop.f32.mrb[7].mxu1  ;;  %vm5459_vm15 = vcmp.ge.f32.partialorder %v2549_v4, 0.0 }
 0x2d2   :  { %v10022_v17 = vsel %vm5316_vm14, 1.0, %v8569_v16  ;;  %vm5315_vm0 = vcmp.ge.f32.partialorder %v5059_v1, 0.0  ;;  %vm10024_vm3 = vmpackc.low %vm5460_vm13, %vm5459_vm15 }
 0x2d3   :  { %v10985_v13 = vsel %vm10024_vm3, 4294967295, %v10984_v13  ;;  %v10029_v7 = vsel %vm5315_vm0, 1.0, %v8569_v16  ;;  %vm10031_vm5 = vmpackc.low %vm5316_vm14, %vm5315_vm0  ;;  %v7220_v56 = vpop.f32.mrb[8].mxu0 }
 0x2d4   :  { %v7700_v24 = vpop.f32.mrb[8].mxu1  ;;  %vm5462_vm7 = vcmp.ge.f32.partialorder %v7220_v56, 0.0  ;;  %v2561_v30 = vpop.f32.mrb[9].mxu0 }
 0x2d5   :  { %vm5318_vm8 = vcmp.ge.f32.partialorder %v7700_v24, 0.0  ;;  %v5071_v34 = vpop.f32.mrb[9].mxu1  ;;  %vm5461_vm13 = vcmp.ge.f32.partialorder %v2561_v30, 0.0  ;;  %v11004_v30 = vmov 0 }
 0x2d6   :  { %v10038_v35 = vsel %vm5318_vm8, 1.0, %v8569_v16  ;;  %vm5317_vm15 = vcmp.ge.f32.partialorder %v5071_v34, 0.0  ;;  %vm10040_vm6 = vmpackc.low %vm5462_vm7, %vm5461_vm13 }
 0x2d7   :  { %v10989_v39 = vsel %vm10040_vm6, 4294967295, %v10988_v39  ;;  %v10045_v42 = vsel %vm5317_vm15, 1.0, %v8569_v16  ;;  %vm10047_vm14 = vmpackc.low %vm5318_vm8, %vm5317_vm15  ;;  %v7223_v48 = vpop.f32.mrb[10].mxu0 }
 0x2d8   :  { %v7703_v51 = vpop.f32.mrb[10].mxu1  ;;  %vm5464_vm0 = vcmp.ge.f32.partialorder %v7223_v48, 0.0  ;;  %v2573_v55 = vpop.f32.mrb[11].mxu0  ;;  %v11044_v60 = vpack.c.bf16 %v10038_v35, %v10045_v42 }
 0x2d9   :  { %vm5320_vm4 = vcmp.ge.f32.partialorder %v7703_v51, 0.0  ;;  %v5083_v57 = vpop.f32.mrb[11].mxu1  ;;  %vm5463_vm7 = vcmp.ge.f32.partialorder %v2573_v55, 0.0 }
 0x2da   :  { %v10054_v18 = vsel %vm5320_vm4, 1.0, %v8569_v16  ;;  %vm5319_vm13 = vcmp.ge.f32.partialorder %v5083_v57, 0.0  ;;  %vm10056_vm6 = vmpackc.low %vm5464_vm0, %vm5463_vm7  ;;  %v8572_v57 = vmov 1.0|1.0  }
 0x2db   :  { %v10993_v37 = vsel %vm10056_vm6, 4294967295, %v10992_v37  ;;  %v10061_v63 = vsel %vm5319_vm13, 1.0, %v8569_v16  ;;  %vm10063_vm8 = vmpackc.low %vm5320_vm4, %vm5319_vm13  ;;  %v7226_v9 = vpop.f32.mrb[12].mxu0 }
 0x2dc   :  { %v7706_v5 = vpop.f32.mrb[12].mxu1  ;;  %vm5466_vm15 = vcmp.ge.f32.partialorder %v7226_v9, 0.0  ;;  %v2585_v31 = vpop.f32.mrb[13].mxu0 }
 0x2dd   :  { %vm5322_vm3 = vcmp.ge.f32.partialorder %v7706_v5, 0.0  ;;  %v5095_v44 = vpop.f32.mrb[13].mxu1  ;;  %vm5465_vm0 = vcmp.ge.f32.partialorder %v2585_v31, 0.0 }
 0x2de   :  { %v10070_v20 = vsel %vm5322_vm3, 1.0, %v8569_v16  ;;  %vm5321_vm7 = vcmp.ge.f32.partialorder %v5095_v44, 0.0  ;;  %vm10072_vm6 = vmpackc.low %vm5466_vm15, %vm5465_vm0 }
 0x2df   :  { %v10997_v52 = vsel %vm10072_vm6, 4294967295, %v10996_v52  ;;  %v10077_v54 = vsel %vm5321_vm7, 1.0, %v8569_v16  ;;  %vm10079_vm4 = vmpackc.low %vm5322_vm3, %vm5321_vm7  ;;  %v7229_v36 = vpop.f32.mrb[14].mxu0 }
 0x2e0   :  { %v7709_v43 = vpop.f32.mrb[14].mxu1  ;;  %vm5468_vm13 = vcmp.ge.f32.partialorder %v7229_v36, 0.0  ;;  %v2597_v32 = vpop.f32.mrb[15].mxu0 }
 0x2e1   :  { %vm5324_vm9 = vcmp.ge.f32.partialorder %v7709_v43, 0.0  ;;  %v5107_v26 = vpop.f32.mrb[15].mxu1  ;;  %vm5467_vm15 = vcmp.ge.f32.partialorder %v2597_v32, 0.0 }
 0x2e2   :  { %v10086_v50 = vsel %vm5324_vm9, 1.0, %v8569_v16  ;;  %vm5323_vm0 = vcmp.ge.f32.partialorder %v5107_v26, 0.0  ;;  %vm10088_vm6 = vmpackc.low %vm5468_vm13, %vm5467_vm15 }
 0x2e3   :  { %v11001_v21 = vsel %vm10088_vm6, 4294967295, %v11000_v21  ;;  %v10093_v15 = vsel %vm5323_vm0, 1.0, %v8569_v16  ;;  %vm10095_vm3 = vmpackc.low %vm5324_vm9, %vm5323_vm0  ;;  %v7232_v8 = vpop.f32.mrb[16].mxu0 }
 0x2e4   :  { %v7712_v4 = vpop.f32.mrb[16].mxu1  ;;  %vm5470_vm7 = vcmp.ge.f32.partialorder %v7232_v8, 0.0  ;;  %v2609_v1 = vpop.f32.mrb[17].mxu0 }
 0x2e5   :  { %vm5326_vm1 = vcmp.ge.f32.partialorder %v7712_v4, 0.0  ;;  %v5119_v56 = vpop.f32.mrb[17].mxu1  ;;  %vm5469_vm13 = vcmp.ge.f32.partialorder %v2609_v1, 0.0 }
 0x2e6   :  { %v10102_v24 = vsel %vm5326_vm1, 1.0, %v8569_v16  ;;  %vm5325_vm15 = vcmp.ge.f32.partialorder %v5119_v56, 0.0  ;;  %vm10104_vm6 = vmpackc.low %vm5470_vm7, %vm5469_vm13 }
 0x2e7   :  { %v11005_v30 = vsel %vm10104_vm6, 4294967295, %v11004_v30  ;;  %v10109_v34 = vsel %vm5325_vm15, 1.0, %v8569_v16  ;;  %vm7924_vm9 = vmpackc.low %vm5326_vm1, %vm5325_vm15  ;;  %v7235_v51 = vpop.f32.mrb[18].mxu0 }
 0x2e8   :  { %v7980_v48 = vpack.c.bf16 %v10102_v24, %v10109_v34  ;;  %v7715_v55 = vpop.f32.mrb[18].mxu1  ;;  %vm5472_vm0 = vcmp.ge.f32.partialorder %v7235_v51, 0.0  ;;  %7925 = vmatprep.subr.msk.bf16.mxu0 %vm7924_vm9, %v8572_v57  ;;  %v2621_v9 = vpop.f32.mrb[19].mxu0 }
 0x2e9   :  { %vm5328_vm11 = vcmp.ge.f32.partialorder %v7715_v55, 0.0  ;;  %v5131_v5 = vpop.f32.mrb[19].mxu1  ;;  %vm5471_vm7 = vcmp.ge.f32.partialorder %v2621_v9, 0.0  ;;  %7927 = vmatpush3.bf16.msk.msra.mxu0 %vm9983_vm12, %v8572_v57 }
 0x2ea   :  { %v10115_v31 = vsel %vm5328_vm11, 1.0, %v8569_v16  ;;  %vm5327_vm13 = vcmp.ge.f32.partialorder %v5131_v5, 0.0  ;;  %vm10120_vm1 = vmpackc.low %vm5472_vm0, %vm5471_vm7 }
 0x2eb   :  { %v10125_v36 = vsel %vm5327_vm13, 1.0, %v8569_v16  ;;  %vm7928_vm15 = vmpackc.low %vm5328_vm11, %vm5327_vm13  ;;  %v7238_v32 = vpop.f32.mrb[20].mxu0 }
 0x2ec   :  { %v7718_v26 = vpop.f32.mrb[20].mxu1  ;;  %vm5474_vm9 = vcmp.ge.f32.partialorder %v7238_v32, 0.0  ;;  %7929 = vmatprep.subr.msk.bf16.mxu0 %vm7928_vm15, %v8572_v57  ;;  %v2633_v8 = vpop.f32.mrb[21].mxu0 }
 0x2ed   :  { %vm5330_vm6 = vcmp.ge.f32.partialorder %v7718_v26, 0.0  ;;  %v5143_v19 = vpop.f32.mrb[21].mxu1  ;;  %vm5473_vm12 = vcmp.ge.f32.partialorder %v2633_v8, 0.0  ;;  %7931 = vmatpush3.bf16.msk.msra.mxu0 %vm9999_vm2, %v8572_v57 }
 0x2ee   :  { %v10131_v4 = vsel %vm5330_vm6, 1.0, %v8569_v16  ;;  %vm5329_vm0 = vcmp.ge.f32.partialorder %v5143_v19, 0.0  ;;  %vm10136_vm11 = vmpackc.low %vm5474_vm9, %vm5473_vm12 }
 0x2ef   :  { %v10141_v56 = vsel %vm5329_vm0, 1.0, %v8569_v16  ;;  %vm7932_vm7 = vmpackc.low %vm5330_vm6, %vm5329_vm0  ;;  %v7241_v55 = vpop.f32.mrb[22].mxu0 }
 0x2f0   :  { %v7721_v9 = vpop.f32.mrb[22].mxu1  ;;  %vm5476_vm13 = vcmp.ge.f32.partialorder %v7241_v55, 0.0  ;;  %7933 = vmatprep.subr.msk.bf16.mxu0 %vm7932_vm7, %v8572_v57  ;;  %v2645_v5 = vpop.f32.mrb[23].mxu0 }
 0x2f1   :  { %vm5332_vm15 = vcmp.ge.f32.partialorder %v7721_v9, 0.0  ;;  %v5155_v0 = vpop.f32.mrb[23].mxu1  ;;  %vm5475_vm2 = vcmp.ge.f32.partialorder %v2645_v5, 0.0  ;;  %7935 = vmatpush3.bf16.msk.msra.mxu0 %vm10015_vm10, %v8572_v57 }
 0x2f2   :  { %v10147_v32 = vsel %vm5332_vm15, 1.0, %v8569_v16  ;;  %vm5331_vm9 = vcmp.ge.f32.partialorder %v5155_v0, 0.0  ;;  %vm10152_vm6 = vmpackc.low %vm5476_vm13, %vm5475_vm2 }
 0x2f3   :  { %v10157_v8 = vsel %vm5331_vm9, 1.0, %v8569_v16  ;;  %vm7936_vm12 = vmpackc.low %vm5332_vm15, %vm5331_vm9  ;;  %v7244_v55 = vpop.f32.mrb[24].mxu0 }
 0x2f4   :  { %v7724_v9 = vpop.f32.mrb[24].mxu1  ;;  %vm5478_vm0 = vcmp.ge.f32.partialorder %v7244_v55, 0.0  ;;  %7937 = vmatprep.subr.msk.bf16.mxu0 %vm7936_vm12, %v8572_v57  ;;  %v2657_v5 = vpop.f32.mrb[25].mxu0 }
 0x2f5   :  { %vm5334_vm7 = vcmp.ge.f32.partialorder %v7724_v9, 0.0  ;;  %v5167_v58 = vpop.f32.mrb[25].mxu1  ;;  %vm5477_vm10 = vcmp.ge.f32.partialorder %v2657_v5, 0.0  ;;  %7939 = vmatpush3.bf16.msk.msra.mxu0 %vm10031_vm5, %v8572_v57 }
 0x2f6   :  { %v10163_v0 = vsel %vm5334_vm7, 1.0, %v8569_v16  ;;  %vm5333_vm13 = vcmp.ge.f32.partialorder %v5167_v58, 0.0  ;;  %vm10168_vm15 = vmpackc.low %vm5478_vm0, %vm5477_vm10 }
 0x2f7   :  { %v10173_v55 = vsel %vm5333_vm13, 1.0, %v8569_v16  ;;  %vm7940_vm2 = vmpackc.low %vm5334_vm7, %vm5333_vm13  ;;  %v7247_v59 = vpop.f32.mrb[26].mxu0 }
 0x2f8   :  { %v7727_v49 = vpop.f32.mrb[26].mxu1  ;;  %vm5480_vm9 = vcmp.ge.f32.partialorder %v7247_v59, 0.0  ;;  %7941 = vmatprep.subr.msk.bf16.mxu0 %vm7940_vm2, %v8572_v57  ;;  %v2669_v5 = vpop.f32.mrb[27].mxu0 }
 0x2f9   :  { %vm5336_vm12 = vcmp.ge.f32.partialorder %v7727_v49, 0.0  ;;  %v5179_v29 = vpop.f32.mrb[27].mxu1  ;;  %vm5479_vm5 = vcmp.ge.f32.partialorder %v2669_v5, 0.0  ;;  %7943 = vmatpush3.bf16.msk.msra.mxu0 %vm10047_vm14, %v8572_v57 }
 0x2fa   :  { %v10179_v58 = vsel %vm5336_vm12, 1.0, %v8569_v16  ;;  %vm5335_vm0 = vcmp.ge.f32.partialorder %v5179_v29, 0.0  ;;  %vm10184_vm7 = vmpackc.low %vm5480_vm9, %vm5479_vm5 }
 0x2fb   :  { %v10189_v59 = vsel %vm5335_vm0, 1.0, %v8569_v16  ;;  %vm7944_vm10 = vmpackc.low %vm5336_vm12, %vm5335_vm0  ;;  %v7250_v9 = vpop.f32.mrb[28].mxu0 }
 0x2fc   :  { %v7730_v11 = vpop.f32.mrb[28].mxu1  ;;  %vm5482_vm13 = vcmp.ge.f32.partialorder %v7250_v9, 0.0  ;;  %7945 = vmatprep.subr.msk.bf16.mxu0 %vm7944_vm10, %v8572_v57  ;;  %v2681_v5 = vpop.f32.mrb[29].mxu0 }
 0x2fd   :  { %vm5338_vm2 = vcmp.ge.f32.partialorder %v7730_v11, 0.0  ;;  %v5191_v45 = vpop.f32.mrb[29].mxu1  ;;  %vm5481_vm14 = vcmp.ge.f32.partialorder %v2681_v5, 0.0  ;;  %7947 = vmatpush3.bf16.msk.msra.mxu0 %vm10063_vm8, %v8572_v57 }
 0x2fe   :  { %v10195_v29 = vsel %vm5338_vm2, 1.0, %v8569_v16  ;;  %vm5337_vm9 = vcmp.ge.f32.partialorder %v5191_v45, 0.0  ;;  %vm10200_vm12 = vmpackc.low %vm5482_vm13, %vm5481_vm14 }
 0x2ff   :  { %v10205_v9 = vsel %vm5337_vm9, 1.0, %v8569_v16  ;;  %vm7948_vm5 = vmpackc.low %vm5338_vm2, %vm5337_vm9  ;;  %v7253_v49 = vpop.f32.mrb[30].mxu0 }
 0x300   :  { %v7733_v61 = vpop.f32.mrb[30].mxu1  ;;  %vm5484_vm0 = vcmp.ge.f32.partialorder %v7253_v49, 0.0  ;;  %7949 = vmatprep.subr.msk.bf16.mxu0 %vm7948_vm5, %v8572_v57  ;;  %v2693_v5 = vpop.f32.mrb[31].mxu0 }
 0x301   :  { %vm5340_vm10 = vcmp.ge.f32.partialorder %v7733_v61, 0.0  ;;  %v5203_v27 = vpop.f32.mrb[31].mxu1  ;;  %vm5483_vm8 = vcmp.ge.f32.partialorder %v2693_v5, 0.0  ;;  %7951 = vmatpush3.bf16.msk.msra.mxu0 %vm10079_vm4, %v8572_v57 }
 0x302   :  { %v10211_v45 = vsel %vm5340_vm10, 1.0, %v8569_v16  ;;  %vm5339_vm13 = vcmp.ge.f32.partialorder %v5203_v27, 0.0  ;;  %vm10216_vm2 = vmpackc.low %vm5484_vm0, %vm5483_vm8  ;;  %vm11022_vm8 = vnez %v11005_v30 }
 0x303   :  { %v10221_v49 = vsel %vm5339_vm13, 1.0, %v8569_v16  ;;  %vm7952_vm14 = vmpackc.low %vm5340_vm10, %vm5339_vm13  ;;  %v7256_v11 = vpop.f32.mrb[32].mxu0 }
 0x304   :  { %v7736_v53 = vpop.f32.mrb[32].mxu1  ;;  %vm5486_vm9 = vcmp.ge.f32.partialorder %v7256_v11, 0.0  ;;  %7953 = vmatprep.subr.msk.bf16.mxu0 %vm7952_vm14, %v8572_v57  ;;  %v2705_v5 = vpop.f32.mrb[33].mxu0 }
 0x305   :  { %vm5342_vm5 = vcmp.ge.f32.partialorder %v7736_v53, 0.0  ;;  %v5215_v38 = vpop.f32.mrb[33].mxu1  ;;  %vm5485_vm4 = vcmp.ge.f32.partialorder %v2705_v5, 0.0  ;;  %7955 = vmatpush3.bf16.msk.msra.mxu0 %vm10095_vm3, %v8572_v57 }
 0x306   :  { %v10227_v27 = vsel %vm5342_vm5, 1.0, %v8569_v16  ;;  %vm5341_vm0 = vcmp.ge.f32.partialorder %v5215_v38, 0.0  ;;  %vm10232_vm10 = vmpackc.low %vm5486_vm9, %vm5485_vm4  ;;  %7982 = vmatprep.subr.msk.bf16.mxu0 %vm11022_vm8, %v7980_v48  ;;  %vm11023_vm9 = vcmask 1041408   ;;  %v11027_v48 = vpack.c.bf16 %v10115_v31, %v10125_v36 }
 0x307   :  { %v10237_v11 = vsel %vm5341_vm0, 1.0, %v8569_v16  ;;  %vm7957_vm13 = vmpackc.low %vm5342_vm5, %vm5341_vm0  ;;  %v7259_v5 = vpop.f32.mrb[34].mxu0  ;;  %vm11024_vm5 = vnez %v10973_v40 }
 0x308   :  { %v8029_v53 = vpack.c.bf16 %v10227_v27, %v10237_v11  ;;  %v7739_v22 = vpop.f32.mrb[34].mxu1  ;;  %vm5488_vm3 = vcmp.ge.f32.partialorder %v7259_v5, 0.0  ;;  %7958 = vmatpush3.bf16.msk.msra.mxu1 %vm7957_vm13, %v8572_v57  ;;  %v2717_v38 = vpop.f32.mrb[35].mxu0  ;;  %6001 = vmatmul.mubr.msk.f32.vlgmr.msra.gmra.mrb[48].mxu0 %vm11023_vm9, %v9964_v41  ;;  %vm11028_vm13 = vmmov %vm11023_vm9  ;;  %v11033_v5 = vpack.c.bf16 %v10131_v4, %v10141_v56  ;;  %v11034_v4 = vpack.c.bf16 %v10006_v25, %v10013_v10 }
 0x309   :  { %vm5344_vm14 = vcmp.ge.f32.partialorder %v7739_v22, 0.0  ;;  %v5227_v61 = vpop.f32.mrb[35].mxu1  ;;  %vm5487_vm4 = vcmp.ge.f32.partialorder %v2717_v38, 0.0  ;;  %7985 = vmatpush3.bf16.msk.msra.mxu0 %vm11024_vm5, %v7983_v23  ;;  %7959 = vmatprep.subr.bf16.mxu1 %v8570_v14 }
 0x30a   :  { %v10250_v24 = vsel %vm5344_vm14, 1.0, %v8569_v16  ;;  %vm5343_vm8 = vcmp.ge.f32.partialorder %v5227_v61, 0.0  ;;  %vm10258_vm0 = vmpackc.low %vm5488_vm3, %vm5487_vm4  ;;  %7988 = vmatprep.subr.msk.bf16.mxu0 %vm10120_vm1, %v11027_v48  ;;  %6051 = vmatprep.mubr.msk.f32.mxu0 %vm11028_vm13, %v9962_v28  ;;  %v11029_v28 = vpack.c.bf16 %v9990_v47, %v9997_v33 }
 0x30b   :  { %v10263_v34 = vsel %vm5343_vm8, 1.0, %v8569_v16  ;;  %vm7960_vm9 = vmpackc.low %vm5344_vm14, %vm5343_vm8  ;;  %v7262_v40 = vpop.f32.mrb[36].mxu0  ;;  %vm11030_vm14 = vnez %v10977_v62 }
 0x30c   :  { %v8033_v2 = vpack.c.bf16 %v10250_v24, %v10263_v34  ;;  %v7742_v6 = vpop.f32.mrb[36].mxu1  ;;  %vm5490_vm3 = vcmp.ge.f32.partialorder %v7262_v40, 0.0  ;;  %7961 = vmatpush3.bf16.msk.msra.mxu1 %vm7960_vm9, %v8572_v57  ;;  %v2729_v23 = vpop.f32.mrb[37].mxu0  ;;  %v11038_v40 = vpack.c.bf16 %v10147_v32, %v10157_v8  ;;  %v11039_v32 = vpack.c.bf16 %v10022_v17, %v10029_v7 }
 0x30d   :  { %vm5346_vm4 = vcmp.ge.f32.partialorder %v7742_v6, 0.0  ;;  %v5239_v61 = vpop.f32.mrb[37].mxu1  ;;  %vm5489_vm5 = vcmp.ge.f32.partialorder %v2729_v23, 0.0  ;;  %7991 = vmatpush3.bf16.msk.msra.mxu0 %vm11030_vm14, %v11029_v28  ;;  %7962 = vmatprep.subr.bf16.mxu1 %v8570_v14  ;;  %v11043_v28 = vpack.c.bf16 %v10163_v0, %v10173_v55  ;;  %v11046_v0 = vmov 0 }
 0x30e   :  { %v10276_v31 = vsel %vm5346_vm4, 1.0, %v8569_v16  ;;  %vm5345_vm1 = vcmp.ge.f32.partialorder %v5239_v61, 0.0  ;;  %vm10284_vm8 = vmpackc.low %vm5490_vm3, %vm5489_vm5  ;;  %7994 = vmatprep.subr.msk.bf16.mxu0 %vm10136_vm11, %v11033_v5  ;;  %vm11035_vm11 = vnez %v10981_v3 }
 0x30f   :  { %v10289_v36 = vsel %vm5345_vm1, 1.0, %v8569_v16  ;;  %vm7963_vm13 = vmpackc.low %vm5346_vm4, %vm5345_vm1  ;;  %v7265_v62 = vpop.f32.mrb[38].mxu0 }
 0x310   :  { %v8037_v47 = vpack.c.bf16 %v10276_v31, %v10289_v36  ;;  %v7745_v33 = vpop.f32.mrb[38].mxu1  ;;  %vm5492_vm9 = vcmp.ge.f32.partialorder %v7265_v62, 0.0  ;;  %7964 = vmatpush3.bf16.msk.msra.mxu1 %vm7963_vm13, %v8572_v57  ;;  %v2741_v22 = vpop.f32.mrb[39].mxu0 }
 0x311   :  { %vm5348_vm3 = vcmp.ge.f32.partialorder %v7745_v33, 0.0  ;;  %v5251_v38 = vpop.f32.mrb[39].mxu1  ;;  %vm5491_vm5 = vcmp.ge.f32.partialorder %v2741_v22, 0.0  ;;  %7997 = vmatpush3.bf16.msk.msra.mxu0 %vm11035_vm11, %v11034_v4  ;;  %7965 = vmatprep.subr.bf16.mxu1 %v8570_v14  ;;  %v11048_v22 = vpack.c.bf16 %v10179_v58, %v10189_v59  ;;  %v11049_v58 = vpack.c.bf16 %v10054_v18, %v10061_v63 }
 0x312   :  { %v10300_v48 = vsel %vm5348_vm3, 1.0, %v8569_v16  ;;  %vm5347_vm14 = vcmp.ge.f32.partialorder %v5251_v38, 0.0  ;;  %vm10308_vm4 = vmpackc.low %vm5492_vm9, %vm5491_vm5  ;;  %8000 = vmatprep.subr.msk.bf16.mxu0 %vm10152_vm6, %v11038_v40  ;;  %vm11040_vm6 = vnez %v10985_v13 }
 0x313   :  { %v10313_v56 = vsel %vm5347_vm14, 1.0, %v8569_v16  ;;  %vm7966_vm1 = vmpackc.low %vm5348_vm3, %vm5347_vm14  ;;  %v7268_v3 = vpop.f32.mrb[40].mxu0 }
 0x314   :  { %v8041_v25 = vpack.c.bf16 %v10300_v48, %v10313_v56  ;;  %v7748_v10 = vpop.f32.mrb[40].mxu1  ;;  %vm5494_vm13 = vcmp.ge.f32.partialorder %v7268_v3, 0.0  ;;  %7967 = vmatpush3.bf16.msk.msra.mxu1 %vm7966_vm1, %v8572_v57  ;;  %v2753_v6 = vpop.f32.mrb[41].mxu0  ;;  %v11053_v3 = vpack.c.bf16 %v10195_v29, %v10205_v9  ;;  %v11054_v29 = vpack.c.bf16 %v10070_v20, %v10077_v54 }
 0x315   :  { %vm5350_vm9 = vcmp.ge.f32.partialorder %v7748_v10, 0.0  ;;  %v5263_v23 = vpop.f32.mrb[41].mxu1  ;;  %vm5493_vm5 = vcmp.ge.f32.partialorder %v2753_v6, 0.0  ;;  %8003 = vmatpush3.bf16.msk.msra.mxu0 %vm11040_vm6, %v11039_v32  ;;  %7968 = vmatprep.subr.bf16.mxu1 %v8570_v14  ;;  %v11058_v32 = vpack.c.bf16 %v10211_v45, %v10221_v49  ;;  %v11059_v20 = vpack.c.bf16 %v10086_v50, %v10093_v15 }
 0x316   :  { %v10324_v61 = vsel %vm5350_vm9, 1.0, %v8569_v16  ;;  %vm5349_vm11 = vcmp.ge.f32.partialorder %v5263_v23, 0.0  ;;  %vm10332_vm3 = vmpackc.low %vm5494_vm13, %vm5493_vm5  ;;  %8006 = vmatprep.subr.msk.bf16.mxu0 %vm10168_vm15, %v11043_v28  ;;  %vm11045_vm15 = vnez %v10989_v39 }
 0x317   :  { %v10337_v8 = vsel %vm5349_vm11, 1.0, %v8569_v16  ;;  %vm7969_vm14 = vmpackc.low %vm5350_vm9, %vm5349_vm11  ;;  %v7271_v13 = vpop.f32.mrb[42].mxu0 }
 0x318   :  { %v8045_v17 = vpack.c.bf16 %v10324_v61, %v10337_v8  ;;  %v7751_v7 = vpop.f32.mrb[42].mxu1  ;;  %vm5496_vm1 = vcmp.ge.f32.partialorder %v7271_v13, 0.0  ;;  %7970 = vmatpush3.bf16.msk.msra.mxu1 %vm7969_vm14, %v8572_v57  ;;  %v2765_v5 = vpop.f32.mrb[43].mxu0 }
 0x319   :  { %vm5352_vm13 = vcmp.ge.f32.partialorder %v7751_v7, 0.0  ;;  %v5275_v62 = vpop.f32.mrb[43].mxu1  ;;  %vm5495_vm5 = vcmp.ge.f32.partialorder %v2765_v5, 0.0  ;;  %8009 = vmatpush3.bf16.msk.msra.mxu0 %vm11045_vm15, %v11044_v60  ;;  %7971 = vmatprep.subr.bf16.mxu1 %v8570_v14 }
 0x31a   :  { %v5960_v33 = vsel %vm5352_vm13, 1.0, %v8569_v16  ;;  %vm5351_vm6 = vcmp.ge.f32.partialorder %v5275_v62, 0.0  ;;  %vm10354_vm9 = vmpackc.low %vm5496_vm1, %vm5495_vm5  ;;  %8012 = vmatprep.subr.msk.bf16.mxu0 %vm10184_vm7, %v11048_v22 }
 0x31b   :  { %v11047_v0 = vsel %vm10354_vm9, 4294967295, %v11046_v0  ;;  %v5959_v55 = vsel %vm5351_vm6, 1.0, %v8569_v16  ;;  %vm7972_vm11 = vmpackc.low %vm5352_vm13, %vm5351_vm6  ;;  %v7274_v35 = vpop.f32.mrb[44].mxu0  ;;  %vm11050_vm9 = vnez %v10993_v37 }
 0x31c   :  { %v8049_v38 = vpack.c.bf16 %v5960_v33, %v5959_v55  ;;  %v7754_v42 = vpop.f32.mrb[44].mxu1  ;;  %vm5498_vm14 = vcmp.ge.f32.partialorder %v7274_v35, 0.0  ;;  %7973 = vmatpush3.bf16.msk.msra.mxu1 %vm7972_vm11, %v8572_v57  ;;  %v2777_v39 = vpop.f32.mrb[45].mxu0 }
 0x31d   :  { %vm5354_vm15 = vcmp.ge.f32.partialorder %v7754_v42, 0.0  ;;  %v5287_v4 = vpop.f32.mrb[45].mxu1  ;;  %vm5497_vm1 = vcmp.ge.f32.partialorder %v2777_v39, 0.0  ;;  %8015 = vmatpush3.bf16.msk.msra.mxu0 %vm11050_vm9, %v11049_v58  ;;  %7974 = vmatprep.subr.bf16.mxu1 %v8570_v14 }
 0x31e   :  { %v5962_v40 = vsel %vm5354_vm15, 1.0, %v8569_v16  ;;  %vm5353_vm5 = vcmp.ge.f32.partialorder %v5287_v4, 0.0  ;;  %vm10372_vm7 = vmpackc.low %vm5498_vm14, %vm5497_vm1  ;;  %8018 = vmatprep.subr.msk.bf16.mxu0 %vm10200_vm12, %v11053_v3  ;;  %vm11055_vm1 = vnez %v10997_v52 }
 0x31f   :  { %v5961_v59 = vsel %vm5353_vm5, 1.0, %v8569_v16  ;;  %vm7975_vm13 = vmpackc.low %vm5354_vm15, %vm5353_vm5  ;;  %v7277_v18 = vpop.f32.mrb[46].mxu0  ;;  %vm11060_vm5 = vnez %v11001_v21 }
 0x320   :  { %v8053_v10 = vpack.c.bf16 %v5962_v40, %v5961_v59  ;;  %v7757_v63 = vpop.f32.mrb[46].mxu1  ;;  %vm5500_vm6 = vcmp.ge.f32.partialorder %v7277_v18, 0.0  ;;  %7976 = vmatpush3.bf16.msk.msra.mxu1 %vm7975_vm13, %v8572_v57  ;;  %v2789_v37 = vpop.f32.mrb[47].mxu0  ;;  %vm11061_vm13 = vcmask 1041408  }
 0x321   :  { %vm5356_vm9 = vcmp.ge.f32.partialorder %v7757_v63, 0.0  ;;  %v5299_v6 = vpop.f32.mrb[47].mxu1  ;;  %vm5499_vm11 = vcmp.ge.f32.partialorder %v2789_v37, 0.0  ;;  %8021 = vmatpush3.bf16.msk.msra.mxu0 %vm11055_vm1, %v11054_v29  ;;  %7977 = vmatprep.subr.bf16.mxu1 %v8570_v14 }
 0x322   :  { %v5964_v23 = vsel %vm5356_vm9, 1.0, %v8569_v16  ;;  %vm5355_vm14 = vcmp.ge.f32.partialorder %v5299_v6, 0.0  ;;  %vm10390_vm12 = vmpackc.low %vm5500_vm6, %vm5499_vm11  ;;  %8024 = vmatprep.subr.msk.bf16.mxu0 %vm10216_vm2, %v11058_v32  ;;  %vm11063_vm6 = vmmov 0  }
 0x323   :  { %v5963_v9 = vsel %vm5355_vm14, 1.0, %v8569_v16  ;;  %vm7978_vm15 = vmpackc.low %vm5356_vm9, %vm5355_vm14 }
 0x324   :  { %v8057_v28 = vpack.c.bf16 %v5964_v23, %v5963_v9  ;;  %7979 = vmatpush3.bf16.msk.msra.mxu1 %vm7978_vm15, %v8572_v57  ;;  %vm11062_vm2 = vmmov %vm11061_vm13 }
 0x325   :  { %8027 = vmatpush3.bf16.msk.msra.mxu0 %vm11060_vm5, %v11059_v20  ;;  %8028 = vmatprep.subr.bf16.mxu1 %v8570_v14 }
 0x327   :  { %7791 = vmatmul.mubr.msk.f32.vlgmr.msra.gmra.mrb[48].mxu1 %vm11061_vm13, %v9969_v12 }
 0x328   :  { %8031 = vmatpush3.bf16.msk.msra.mxu1 %vm10232_vm10, %v8029_v53  ;;  %6052 = vmatmul.mubr.msk.f32.vlgmr.msra.gmra.mrb[50].mxu0 %vm11062_vm2, %v9964_v41  ;;  %vm11064_vm10 = vnez %v11047_v0 }
 0x329   :  { %8032 = vmatprep.subr.bf16.mxu1 %v8570_v14  ;;  %7825 = vmatprep.mubr.msk.f32.mxu1 %vm11063_vm6, %v8569_v16 }
 0x32c   :  { %8035 = vmatpush3.bf16.msk.msra.mxu1 %vm10258_vm0, %v8033_v2  ;;  %vm11065_vm0 = vmmov %vm11062_vm2 }
 0x32d   :  { %8036 = vmatprep.subr.bf16.mxu1 %v8570_v14 }
 0x330   :  { %8039 = vmatpush3.bf16.msk.msra.mxu1 %vm10284_vm8, %v8037_v47  ;;  %vm11066_vm8 = vmmov %vm11065_vm0 }
 0x331   :  { %8040 = vmatprep.subr.bf16.mxu1 %v8570_v14 }
 0x334   :  { %8043 = vmatpush3.bf16.msk.msra.mxu1 %vm10308_vm4, %v8041_v25 }
 0x335   :  { %8044 = vmatprep.subr.bf16.mxu1 %v8570_v14 }
 0x338   :  { %8047 = vmatpush3.bf16.msk.msra.mxu1 %vm10332_vm3, %v8045_v17 }
 0x339   :  { %8048 = vmatprep.subr.bf16.mxu1 %v8570_v14 }
 0x33c   :  { %8051 = vmatpush3.bf16.msk.msra.mxu1 %vm11064_vm10, %v8049_v38 }
 0x33d   :  { %8052 = vmatprep.subr.bf16.mxu1 %v8570_v14 }
 0x340   :  { %8055 = vmatpush3.bf16.msk.msra.mxu1 %vm10372_vm7, %v8053_v10 }
 0x341   :  { %8056 = vmatprep.subr.bf16.mxu1 %v8570_v14  ;;  %v5887_v14 = vld [vmem:[#allocation4] sm:$0xf] }
 0x344   :  { %8059 = vmatpush3.bf16.msk.msra.mxu1 %vm10390_vm12, %v8057_v28 }
 0x347   :  { %7826 = vmatmul.mubr.msk.f32.vlgmr.msra.gmra.mrb[50].mxu1 %vm11065_vm0, %v9969_v12 }
 0x3db   :  { %v6726_v16 = vpop.f32.mrb[48].mxu0 }
 0x3dc   :  { %v6727_v41 = vpop.f32.mrb[49].mxu0 }
 0x3dd   :  { %v6728_v52 = vadd.f32 %v6727_v41, %v6726_v16 }
 0x3fa   :  { %v5743_v54 = vpop.f32.mrb[48].mxu1 }
 0x3fb   :  { %v6778_v50 = vpop.f32.mrb[50].mxu0  ;;  %v5744_v21 = vadd.f32 %v6728_v52, %v5743_v54  ;;  %v7792_v15 = vpop.f32.mrb[49].mxu1 }
 0x3fc   :  { %v6779_v57 = vpop.f32.mrb[51].mxu0 }
 0x3fd   :  { %v6780_v43 = vadd.f32 %v6779_v57, %v6778_v50 }
 0x41a   :  { %v5883_v51 = vpop.f32.mrb[50].mxu1 }
 0x41b   :  { %v5884_v45 = vadd.f32 %v6780_v43, %v5883_v51  ;;  %v7827_v49 = vpop.f32.mrb[51].mxu1 }
 0x41d   :  { %v5889_v27 = vrot.slane %v5884_v45, 6 }
 0x41f   :  { %v5891_v11 = vsel %vm11066_vm8, %v5744_v21, %v5889_v27 }
 0x420   :  { %v5892_v53 = vadd.f32 %v5891_v11, %v5887_v14 }
 0x422   :  { %5893 = vst [vmem:[#allocation4] sm:$0xf] %v5892_v53 }
 0x423   :  { %8556 = shalt.err (!%p8553_p4)
}
 0x424   :  { %s8557_s28 = scalar_lea.hbm %s10471_s5, 64 }
 0x425   :  { %p8558_p5 = scmp.ne.s32.totalorder %s10471_s5, %s8557_s28  ;;  %p8561_p6 = scmp.lt.u32.totalorder %s8557_s28, %s10471_s5 }
 0x427   :  { %p8563_p7 = pnand %p8561_p6, %p8558_p5 }
 0x429   :  { %8566 = shalt.err (!%p8563_p7)
}
 0x42a   :  { %5903 = dma.vmem_to_hbm [thread:$0]  %s5901_s4, 64, %s10471_s5, [#allocation5]  }
 0x42b   :  { %8567 = dma.done.wait [#allocation5], 64  }
 0x42c   :  { %8568 = vsyncadd [#allocation5], 4294967232 }
 0x42d   :  { %5907 = vsyncpa [#allocation5], 1 }

</bundles_post_ra>
